<compile_context>
chip_gen: v7x
topology: tpu7x:2x2x1
jax: 0.10.0
libtpu: 0.0.40
codegen_flags: <defaults>
</compile_context>

<pallas_src>
import functools

import jax
import jax.numpy as jnp
from jax import lax
from jax.experimental import pallas as pl
from jax.experimental.pallas import tpu as pltpu


def _default_vmem_limit_bytes():
    # Half of physical VMEM is a safe scoped limit on every generation
    # (v5e/v6e: 64 MiB of 128; v7x: 32 MiB of 64, which is its default).
    try:
        cap = int(pltpu.get_tpu_info().vmem_capacity_bytes)
        return max(32 << 20, min(cap // 2, 96 << 20))
    except Exception:
        return 32 << 20


_VMEM_LIMIT_BYTES = _default_vmem_limit_bytes()


def _pick_depth_tile(D, HW, OC, itemsize=4, target_block_bytes=2 << 20):
    """Depth tile TD such that TD | D, the (OC, TD*HW) output slab is lane-dense
    (TD*HW % 128 == 0) and <= ~target_block_bytes, preferring >= 2 chunks per batch so the
    pipeline has steps to overlap output writeback and both v7x cores have work."""
    lane_ok = [td for td in range(1, D + 1) if D % td == 0 and (td * HW) % 128 == 0]
    if not lane_ok:
        return D              # fallback: one full-depth block (block dim == full array dim)
    fit = [td for td in lane_ok if OC * td * HW * itemsize <= target_block_bytes]
    if not fit:
        return min(lane_ok)
    multi = [td for td in fit if D // td >= 2]
    return max(multi) if multi else max(fit)


def _fused_conv3d_relu_kernel(x_ref, w_ref, b_ref, m_ref, o_ref, taps_ref, *,
                              TD, SD, W, HW, L, KD, KH, KW, ph, pw, OC, KHW, KHW_PAD):
    """One (batch, depth-chunk) grid step.

    x_ref   : (1, 1, SD, HWs)  SD = TD+KD-1 depth-padded source planes of this chunk; each
                               plane is H*W values with L zero-slack on both sides so every
                               (kh, kw) shift is a static in-plane lane slice.
    w_ref   : (KD, OC, KHW_PAD) weights; column kh*KW+kw of w_ref[kd]; cols >= KH*KW are 0.
    b_ref   : (OC, 1)           bias.
    m_ref   : (KW, HW)          width-validity mask per kw (kills lanes that wrapped rows).
    o_ref   : (1, OC, TD*HW)    lane-dense channel-first output slab of this chunk.
    taps_ref: (KHW_PAD, SD*HW)  VMEM scratch: row kh*KW+kw, columns [s*HW,(s+1)*HW) hold the
                                shifted+masked source plane s (built once, reused by every
                                kd / output plane that consumes it).
    """
    TDHW = TD * HW

    # Guard the zero-weight padding rows against stale NaN/Inf in scratch (one cheap store).
    if KHW_PAD > KHW:
        taps_ref[KHW:, :] = jnp.zeros((KHW_PAD - KHW, SD * HW), jnp.float32)

    # Build the KH*KW shifted+masked rows once per source plane (tap reuse across kd).
    for kh in range(KH):
        base = L + (kh - ph) * W - pw
        for kw in range(KW):
            r = kh * KW + kw
            off = base + kw
            msk = m_ref[kw:kw + 1, :] if kw != pw else None      # centre tap needs no mask
            for s in range(SD):
                seg = x_ref[0, 0, s:s + 1, off:off + HW]         # (1, HW) shifted plane
                if msk is not None:
                    seg = seg * msk
                taps_ref[r:r + 1, s * HW:(s + 1) * HW] = seg

    # MXU contraction:
    #   out[:, td*HW:(td+1)*HW] = sum_kd W_kd @ taps[:, (td+kd)*HW : (td+kd+1)*HW]
    #                          == sum_kd W_kd @ taps[:, kd*HW : kd*HW + TD*HW]
    acc = jnp.dot(w_ref[0], taps_ref[:, 0:TDHW],
                  preferred_element_type=jnp.float32,
                  precision=lax.Precision.HIGHEST)
    for kd in range(1, KD):
        acc = acc + jnp.dot(w_ref[kd], taps_ref[:, kd * HW:kd * HW + TDHW],
                            preferred_element_type=jnp.float32,
                            precision=lax.Precision.HIGHEST)
    acc = jnp.maximum(acc + b_ref[...], 0.0)                     # bias + ReLU
    o_ref[0] = acc.astype(o_ref.dtype)


def initial_conv_block(x, weight, bias, ksize):
    """x: (N, 1, D, H, W) f32; weight: (32, 1, KD, KH, KW); bias: (32,).

    Returns (N, 32, D, H, W) f32 == relu(conv3d(x, stride=1, padding='same')).
    """
    N, C, D, H, W = x.shape
    assert C == 1, "InitialConvBlock has a single input channel"
    OC = weight.shape[0]
    KD, KH, KW = ksize
    # TODO(synk): even kernel sizes change PyTorch's output size with padding=k//2; not handled.
    assert KD % 2 == 1 and KH % 2 == 1 and KW % 2 == 1
    pd, ph, pw = KD // 2, KH // 2, KW // 2
    HW = H * W
    L = ph * W + pw                            # per-plane zero slack on each side
    HWs = HW + 2 * L
    KHW = KH * KW
    KHW_PAD = ((KHW + 7) // 8) * 8             # pad taps/weights to a sublane multiple (9->16)

    TD = _pick_depth_tile(D, HW, OC)
    SD = TD + KD - 1                           # source planes per chunk (with halo)
    num_chunks = D // TD

    # ---- cheap host-side glue (single input channel -> tiny next to the 32x output) ----
    xr = x[:, 0].astype(jnp.float32).reshape(N, D, HW)
    xp = jnp.pad(xr, ((0, 0), (pd, pd), (L, L)))                       # (N, D+2pd, HWs)
    cidx = (jnp.arange(num_chunks, dtype=jnp.int32)[:, None] * TD
            + jnp.arange(SD, dtype=jnp.int32)[None, :])                # (num_chunks, SD)
    x_chunks = xp[:, cidx, :]                                          # (N, nc, SD, HWs)

    wk = weight[:, 0].astype(jnp.float32).reshape(OC, KD, KHW)
    wk = jnp.transpose(wk, (1, 0, 2))                                  # (KD, OC, KHW)
    wk = jnp.pad(wk, ((0, 0), (0, 0), (0, KHW_PAD - KHW)))             # (KD, OC, KHW_PAD)
    b2 = bias.astype(jnp.float32).reshape(OC, 1)

    w_idx = jnp.arange(HW, dtype=jnp.int32) % W
    masks = jnp.stack(
        [((w_idx + (kw - pw) >= 0) & (w_idx + (kw - pw) < W)).astype(jnp.float32)
         for kw in range(KW)], axis=0)                                 # (KW, HW)

    kernel = functools.partial(
        _fused_conv3d_relu_kernel,
        TD=TD, SD=SD, W=W, HW=HW, L=L, KD=KD, KH=KH, KW=KW,
        ph=ph, pw=pw, OC=OC, KHW=KHW, KHW_PAD=KHW_PAD)

    cost = pl.CostEstimate(
        flops=2 * N * OC * D * HW * KD * KHW,
        transcendentals=0,
        bytes_accessed=(N * num_chunks * SD * HWs + N * OC * D * HW
                        + KD * OC * KHW_PAD + OC + KW * HW) * 4)

    out = pl.pallas_call(
        kernel,
        out_shape=jax.ShapeDtypeStruct((N, OC, D * HW), jnp.float32),
        grid=(N, num_chunks),
        in_specs=[
            pl.BlockSpec((1, 1, SD, HWs), lambda n, t: (n, t, 0, 0)),   # chunk + halo planes
            pl.BlockSpec((KD, OC, KHW_PAD), lambda n, t: (0, 0, 0)),    # weights (resident)
            pl.BlockSpec((OC, 1), lambda n, t: (0, 0)),                 # bias (resident)
            pl.BlockSpec((KW, HW), lambda n, t: (0, 0)),                # width masks (resident)
        ],
        out_specs=pl.BlockSpec((1, OC, TD * HW), lambda n, t: (n, 0, t)),
        scratch_shapes=[pltpu.VMEM((KHW_PAD, SD * HW), jnp.float32)],
        compiler_params=pltpu.CompilerParams(
            dimension_semantics=("parallel", "parallel"),
            vmem_limit_bytes=_VMEM_LIMIT_BYTES),
        cost_estimate=cost,
    )(x_chunks, wk, b2, masks)

    # (N, OC, D*H*W) -> NCDHW is a free reshape (no transpose, no extra HBM pass).
    return out.reshape(N, OC, D, H, W)


def _reference(x, weight, bias, ksize):
    pd, ph, pw = (k // 2 for k in ksize)
    y = lax.conv_general_dilated(
        x, weight,
        window_strides=(1, 1, 1),
        padding=((pd, pd), (ph, ph), (pw, pw)),
        dimension_numbers=("NCDHW", "OIDHW", "NCDHW"),
        precision=lax.Precision.HIGHEST)
    y = y + bias.reshape(1, -1, 1, 1, 1)
    return jnp.maximum(y, 0.0)


if __name__ == "__main__":
    ksize = (3, 3, 3)
    N, D, H, W = 2, 8, 8, 8
    OC = 32

    key_w, key_b, key_x = jax.random.split(jax.random.PRNGKey(0), 3)
    fan_in = 1 * ksize[0] * ksize[1] * ksize[2]
    bound = 1.0 / (fan_in ** 0.5)
    weight = jax.random.uniform(key_w, (OC, 1) + ksize,
                                minval=-bound, maxval=bound, dtype=jnp.float32)
    bias = jax.random.uniform(key_b, (OC,),
                              minval=-bound, maxval=bound, dtype=jnp.float32)
    x = jax.random.normal(key_x, (N, 1, D, H, W), dtype=jnp.float32)

    fn = jax.jit(functools.partial(initial_conv_block, ksize=ksize))
    out = jax.block_until_ready(fn(x, weight, bias))

    ref = jax.block_until_ready(_reference(x, weight, bias, ksize))
    assert out.shape == (N, OC, D, H, W)
    assert jnp.allclose(out, ref, atol=1e-5, rtol=1e-5), "mismatch vs conv reference"

    print("KERNEL_OK")
</pallas_src>

<mosaic_0001>
module attributes {stable_mosaic.version = 11 : i64} {
  func.func @_fused_conv3d_relu_kernel(%arg0: i32, %arg1: i32, %arg2: memref<1x1x6x82xf32, #tpu.memory_space<vmem>>, %arg3: memref<3x32x16xf32, #tpu.memory_space<vmem>>, %arg4: memref<32x1xf32, #tpu.memory_space<vmem>>, %arg5: memref<3x64xf32, #tpu.memory_space<vmem>>, %arg6: memref<1x32x256xf32, #tpu.memory_space<vmem>>, %arg7: memref<16x384xf32, #tpu.memory_space<vmem>>) attributes {dimension_semantics = [#tpu.dimension_semantics<parallel>, #tpu.dimension_semantics<parallel>], iteration_bounds = array<i64: 2, 2>, scalar_prefetch = 0 : i64, scratch_operands = 1 : i64, tpu.core_type = #tpu.core_type<tc>, window_params = [{transform_indices = @transform_0, window_bounds = array<i64: 1, 1, 6, 82>}, {pipeline_mode = #tpu.pipeline_mode<synchronous>, transform_indices = @transform_1, window_bounds = array<i64: 3, 32, 16>}, {pipeline_mode = #tpu.pipeline_mode<synchronous>, transform_indices = @transform_2, window_bounds = array<i64: 32, 1>}, {pipeline_mode = #tpu.pipeline_mode<synchronous>, transform_indices = @transform_3, window_bounds = array<i64: 3, 64>}, {transform_indices = @transform_4, window_bounds = array<i64: 1, 32, 256>}]} {
    %cst = arith.constant 0.000000e+00 : f32
    %0 = vector.broadcast %cst : f32 to vector<7x384xf32>
    %c9 = arith.constant 9 : index
    %c0 = arith.constant 0 : index
    %1 = vector.load %arg7[%c9, %c0] : memref<16x384xf32, #tpu.memory_space<vmem>>, vector<7x384xf32>
    tpu.vector_store %arg7[%c9, %c0], %0 {strides = array<i32>} : memref<16x384xf32, #tpu.memory_space<vmem>>, vector<7x384xf32>,
    %c0_0 = arith.constant 0 : index
    %c0_1 = arith.constant 0 : index
    %2 = vector.load %arg5[%c0_0, %c0_1] : memref<3x64xf32, #tpu.memory_space<vmem>>, vector<1x64xf32>
    %c0_2 = arith.constant 0 : index
    %c0_3 = arith.constant 0 : index
    %c0_4 = arith.constant 0 : index
    %c0_5 = arith.constant 0 : index
    %3 = vector.load %arg2[%c0_2, %c0_3, %c0_4, %c0_5] : memref<1x1x6x82xf32, #tpu.memory_space<vmem>>, vector<1x1x1x64xf32>
    %4 = vector.shape_cast %3 : vector<1x1x1x64xf32> to vector<1x64xf32>
    %5 = arith.mulf %4, %2 : vector<1x64xf32>
    %c0_6 = arith.constant 0 : index
    %c0_7 = arith.constant 0 : index
    %6 = vector.load %arg7[%c0_6, %c0_7] : memref<16x384xf32, #tpu.memory_space<vmem>>, vector<1x64xf32>
    tpu.vector_store %arg7[%c0_6, %c0_7], %5 {strides = array<i32>} : memref<16x384xf32, #tpu.memory_space<vmem>>, vector<1x64xf32>,
    %c0_8 = arith.constant 0 : index
    %c0_9 = arith.constant 0 : index
    %c1 = arith.constant 1 : index
    %c0_10 = arith.constant 0 : index
    %7 = vector.load %arg2[%c0_8, %c0_9, %c1, %c0_10] : memref<1x1x6x82xf32, #tpu.memory_space<vmem>>, vector<1x1x1x64xf32>
    %8 = vector.shape_cast %7 : vector<1x1x1x64xf32> to vector<1x64xf32>
    %9 = arith.mulf %8, %2 : vector<1x64xf32>
    %c0_11 = arith.constant 0 : index
    %c64 = arith.constant 64 : index
    %10 = vector.load %arg7[%c0_11, %c64] : memref<16x384xf32, #tpu.memory_space<vmem>>, vector<1x64xf32>
    tpu.vector_store %arg7[%c0_11, %c64], %9 {strides = array<i32>} : memref<16x384xf32, #tpu.memory_space<vmem>>, vector<1x64xf32>,
    %c0_12 = arith.constant 0 : index
    %c0_13 = arith.constant 0 : index
    %c2 = arith.constant 2 : index
    %c0_14 = arith.constant 0 : index
    %11 = vector.load %arg2[%c0_12, %c0_13, %c2, %c0_14] : memref<1x1x6x82xf32, #tpu.memory_space<vmem>>, vector<1x1x1x64xf32>
    %12 = vector.shape_cast %11 : vector<1x1x1x64xf32> to vector<1x64xf32>
    %13 = arith.mulf %12, %2 : vector<1x64xf32>
    %c0_15 = arith.constant 0 : index
    %c128 = arith.constant 128 : index
    %14 = vector.load %arg7[%c0_15, %c128] : memref<16x384xf32, #tpu.memory_space<vmem>>, vector<1x64xf32>
    tpu.vector_store %arg7[%c0_15, %c128], %13 {strides = array<i32>} : memref<16x384xf32, #tpu.memory_space<vmem>>, vector<1x64xf32>,
    %c0_16 = arith.constant 0 : index
    %c0_17 = arith.constant 0 : index
    %c3 = arith.constant 3 : index
    %c0_18 = arith.constant 0 : index
    %15 = vector.load %arg2[%c0_16, %c0_17, %c3, %c0_18] : memref<1x1x6x82xf32, #tpu.memory_space<vmem>>, vector<1x1x1x64xf32>
    %16 = vector.shape_cast %15 : vector<1x1x1x64xf32> to vector<1x64xf32>
    %17 = arith.mulf %16, %2 : vector<1x64xf32>
    %c0_19 = arith.constant 0 : index
    %c192 = arith.constant 192 : index
    %18 = vector.load %arg7[%c0_19, %c192] : memref<16x384xf32, #tpu.memory_space<vmem>>, vector<1x64xf32>
    tpu.vector_store %arg7[%c0_19, %c192], %17 {strides = array<i32>} : memref<16x384xf32, #tpu.memory_space<vmem>>, vector<1x64xf32>,
    %c0_20 = arith.constant 0 : index
    %c0_21 = arith.constant 0 : index
    %c4 = arith.constant 4 : index
    %c0_22 = arith.constant 0 : index
    %19 = vector.load %arg2[%c0_20, %c0_21, %c4, %c0_22] : memref<1x1x6x82xf32, #tpu.memory_space<vmem>>, vector<1x1x1x64xf32>
    %20 = vector.shape_cast %19 : vector<1x1x1x64xf32> to vector<1x64xf32>
    %21 = arith.mulf %20, %2 : vector<1x64xf32>
    %c0_23 = arith.constant 0 : index
    %c256 = arith.constant 256 : index
    %22 = vector.load %arg7[%c0_23, %c256] : memref<16x384xf32, #tpu.memory_space<vmem>>, vector<1x64xf32>
    tpu.vector_store %arg7[%c0_23, %c256], %21 {strides = array<i32>} : memref<16x384xf32, #tpu.memory_space<vmem>>, vector<1x64xf32>,
    %c0_24 = arith.constant 0 : index
    %c0_25 = arith.constant 0 : index
    %c5 = arith.constant 5 : index
    %c0_26 = arith.constant 0 : index
    %23 = vector.load %arg2[%c0_24, %c0_25, %c5, %c0_26] : memref<1x1x6x82xf32, #tpu.memory_space<vmem>>, vector<1x1x1x64xf32>
    %24 = vector.shape_cast %23 : vector<1x1x1x64xf32> to vector<1x64xf32>
    %25 = arith.mulf %24, %2 : vector<1x64xf32>
    %c0_27 = arith.constant 0 : index
    %c320 = arith.constant 320 : index
    %26 = vector.load %arg7[%c0_27, %c320] : memref<16x384xf32, #tpu.memory_space<vmem>>, vector<1x64xf32>
    tpu.vector_store %arg7[%c0_27, %c320], %25 {strides = array<i32>} : memref<16x384xf32, #tpu.memory_space<vmem>>, vector<1x64xf32>,
    %c0_28 = arith.constant 0 : index
    %c0_29 = arith.constant 0 : index
    %c0_30 = arith.constant 0 : index
    %c1_31 = arith.constant 1 : index
    %27 = vector.load %arg2[%c0_28, %c0_29, %c0_30, %c1_31] : memref<1x1x6x82xf32, #tpu.memory_space<vmem>>, vector<1x1x1x64xf32>
    %28 = vector.shape_cast %27 : vector<1x1x1x64xf32> to vector<1x64xf32>
    %c1_32 = arith.constant 1 : index
    %c0_33 = arith.constant 0 : index
    %29 = vector.load %arg7[%c1_32, %c0_33] : memref<16x384xf32, #tpu.memory_space<vmem>>, vector<1x64xf32>
    tpu.vector_store %arg7[%c1_32, %c0_33], %28 {strides = array<i32>} : memref<16x384xf32, #tpu.memory_space<vmem>>, vector<1x64xf32>,
    %c0_34 = arith.constant 0 : index
    %c0_35 = arith.constant 0 : index
    %c1_36 = arith.constant 1 : index
    %c1_37 = arith.constant 1 : index
    %30 = vector.load %arg2[%c0_34, %c0_35, %c1_36, %c1_37] : memref<1x1x6x82xf32, #tpu.memory_space<vmem>>, vector<1x1x1x64xf32>
    %31 = vector.shape_cast %30 : vector<1x1x1x64xf32> to vector<1x64xf32>
    %c1_38 = arith.constant 1 : index
    %c64_39 = arith.constant 64 : index
    %32 = vector.load %arg7[%c1_38, %c64_39] : memref<16x384xf32, #tpu.memory_space<vmem>>, vector<1x64xf32>
    tpu.vector_store %arg7[%c1_38, %c64_39], %31 {strides = array<i32>} : memref<16x384xf32, #tpu.memory_space<vmem>>, vector<1x64xf32>,
    %c0_40 = arith.constant 0 : index
    %c0_41 = arith.constant 0 : index
    %c2_42 = arith.constant 2 : index
    %c1_43 = arith.constant 1 : index
    %33 = vector.load %arg2[%c0_40, %c0_41, %c2_42, %c1_43] : memref<1x1x6x82xf32, #tpu.memory_space<vmem>>, vector<1x1x1x64xf32>
    %34 = vector.shape_cast %33 : vector<1x1x1x64xf32> to vector<1x64xf32>
    %c1_44 = arith.constant 1 : index
    %c128_45 = arith.constant 128 : index
    %35 = vector.load %arg7[%c1_44, %c128_45] : memref<16x384xf32, #tpu.memory_space<vmem>>, vector<1x64xf32>
    tpu.vector_store %arg7[%c1_44, %c128_45], %34 {strides = array<i32>} : memref<16x384xf32, #tpu.memory_space<vmem>>, vector<1x64xf32>,
    %c0_46 = arith.constant 0 : index
    %c0_47 = arith.constant 0 : index
    %c3_48 = arith.constant 3 : index
    %c1_49 = arith.constant 1 : index
    %36 = vector.load %arg2[%c0_46, %c0_47, %c3_48, %c1_49] : memref<1x1x6x82xf32, #tpu.memory_space<vmem>>, vector<1x1x1x64xf32>
    %37 = vector.shape_cast %36 : vector<1x1x1x64xf32> to vector<1x64xf32>
    %c1_50 = arith.constant 1 : index
    %c192_51 = arith.constant 192 : index
    %38 = vector.load %arg7[%c1_50, %c192_51] : memref<16x384xf32, #tpu.memory_space<vmem>>, vector<1x64xf32>
    tpu.vector_store %arg7[%c1_50, %c192_51], %37 {strides = array<i32>} : memref<16x384xf32, #tpu.memory_space<vmem>>, vector<1x64xf32>,
    %c0_52 = arith.constant 0 : index
    %c0_53 = arith.constant 0 : index
    %c4_54 = arith.constant 4 : index
    %c1_55 = arith.constant 1 : index
    %39 = vector.load %arg2[%c0_52, %c0_53, %c4_54, %c1_55] : memref<1x1x6x82xf32, #tpu.memory_space<vmem>>, vector<1x1x1x64xf32>
    %40 = vector.shape_cast %39 : vector<1x1x1x64xf32> to vector<1x64xf32>
    %c1_56 = arith.constant 1 : index
    %c256_57 = arith.constant 256 : index
    %41 = vector.load %arg7[%c1_56, %c256_57] : memref<16x384xf32, #tpu.memory_space<vmem>>, vector<1x64xf32>
    tpu.vector_store %arg7[%c1_56, %c256_57], %40 {strides = array<i32>} : memref<16x384xf32, #tpu.memory_space<vmem>>, vector<1x64xf32>,
    %c0_58 = arith.constant 0 : index
    %c0_59 = arith.constant 0 : index
    %c5_60 = arith.constant 5 : index
    %c1_61 = arith.constant 1 : index
    %42 = vector.load %arg2[%c0_58, %c0_59, %c5_60, %c1_61] : memref<1x1x6x82xf32, #tpu.memory_space<vmem>>, vector<1x1x1x64xf32>
    %43 = vector.shape_cast %42 : vector<1x1x1x64xf32> to vector<1x64xf32>
    %c1_62 = arith.constant 1 : index
    %c320_63 = arith.constant 320 : index
    %44 = vector.load %arg7[%c1_62, %c320_63] : memref<16x384xf32, #tpu.memory_space<vmem>>, vector<1x64xf32>
    tpu.vector_store %arg7[%c1_62, %c320_63], %43 {strides = array<i32>} : memref<16x384xf32, #tpu.memory_space<vmem>>, vector<1x64xf32>,
    %c2_64 = arith.constant 2 : index
    %c0_65 = arith.constant 0 : index
    %45 = vector.load %arg5[%c2_64, %c0_65] : memref<3x64xf32, #tpu.memory_space<vmem>>, vector<1x64xf32>
    %c0_66 = arith.constant 0 : index
    %c0_67 = arith.constant 0 : index
    %c0_68 = arith.constant 0 : index
    %c2_69 = arith.constant 2 : index
    %46 = vector.load %arg2[%c0_66, %c0_67, %c0_68, %c2_69] : memref<1x1x6x82xf32, #tpu.memory_space<vmem>>, vector<1x1x1x64xf32>
    %47 = vector.shape_cast %46 : vector<1x1x1x64xf32> to vector<1x64xf32>
    %48 = arith.mulf %47, %45 : vector<1x64xf32>
    %c2_70 = arith.constant 2 : index
    %c0_71 = arith.constant 0 : index
    %49 = vector.load %arg7[%c2_70, %c0_71] : memref<16x384xf32, #tpu.memory_space<vmem>>, vector<1x64xf32>
    tpu.vector_store %arg7[%c2_70, %c0_71], %48 {strides = array<i32>} : memref<16x384xf32, #tpu.memory_space<vmem>>, vector<1x64xf32>,
    %c0_72 = arith.constant 0 : index
    %c0_73 = arith.constant 0 : index
    %c1_74 = arith.constant 1 : index
    %c2_75 = arith.constant 2 : index
    %50 = vector.load %arg2[%c0_72, %c0_73, %c1_74, %c2_75] : memref<1x1x6x82xf32, #tpu.memory_space<vmem>>, vector<1x1x1x64xf32>
    %51 = vector.shape_cast %50 : vector<1x1x1x64xf32> to vector<1x64xf32>
    %52 = arith.mulf %51, %45 : vector<1x64xf32>
    %c2_76 = arith.constant 2 : index
    %c64_77 = arith.constant 64 : index
    %53 = vector.load %arg7[%c2_76, %c64_77] : memref<16x384xf32, #tpu.memory_space<vmem>>, vector<1x64xf32>
    tpu.vector_store %arg7[%c2_76, %c64_77], %52 {strides = array<i32>} : memref<16x384xf32, #tpu.memory_space<vmem>>, vector<1x64xf32>,
    %c0_78 = arith.constant 0 : index
    %c0_79 = arith.constant 0 : index
    %c2_80 = arith.constant 2 : index
    %c2_81 = arith.constant 2 : index
    %54 = vector.load %arg2[%c0_78, %c0_79, %c2_80, %c2_81] : memref<1x1x6x82xf32, #tpu.memory_space<vmem>>, vector<1x1x1x64xf32>
    %55 = vector.shape_cast %54 : vector<1x1x1x64xf32> to vector<1x64xf32>
    %56 = arith.mulf %55, %45 : vector<1x64xf32>
    %c2_82 = arith.constant 2 : index
    %c128_83 = arith.constant 128 : index
    %57 = vector.load %arg7[%c2_82, %c128_83] : memref<16x384xf32, #tpu.memory_space<vmem>>, vector<1x64xf32>
    tpu.vector_store %arg7[%c2_82, %c128_83], %56 {strides = array<i32>} : memref<16x384xf32, #tpu.memory_space<vmem>>, vector<1x64xf32>,
    %c0_84 = arith.constant 0 : index
    %c0_85 = arith.constant 0 : index
    %c3_86 = arith.constant 3 : index
    %c2_87 = arith.constant 2 : index
    %58 = vector.load %arg2[%c0_84, %c0_85, %c3_86, %c2_87] : memref<1x1x6x82xf32, #tpu.memory_space<vmem>>, vector<1x1x1x64xf32>
    %59 = vector.shape_cast %58 : vector<1x1x1x64xf32> to vector<1x64xf32>
    %60 = arith.mulf %59, %45 : vector<1x64xf32>
    %c2_88 = arith.constant 2 : index
    %c192_89 = arith.constant 192 : index
    %61 = vector.load %arg7[%c2_88, %c192_89] : memref<16x384xf32, #tpu.memory_space<vmem>>, vector<1x64xf32>
    tpu.vector_store %arg7[%c2_88, %c192_89], %60 {strides = array<i32>} : memref<16x384xf32, #tpu.memory_space<vmem>>, vector<1x64xf32>,
    %c0_90 = arith.constant 0 : index
    %c0_91 = arith.constant 0 : index
    %c4_92 = arith.constant 4 : index
    %c2_93 = arith.constant 2 : index
    %62 = vector.load %arg2[%c0_90, %c0_91, %c4_92, %c2_93] : memref<1x1x6x82xf32, #tpu.memory_space<vmem>>, vector<1x1x1x64xf32>
    %63 = vector.shape_cast %62 : vector<1x1x1x64xf32> to vector<1x64xf32>
    %64 = arith.mulf %63, %45 : vector<1x64xf32>
    %c2_94 = arith.constant 2 : index
    %c256_95 = arith.constant 256 : index
    %65 = vector.load %arg7[%c2_94, %c256_95] : memref<16x384xf32, #tpu.memory_space<vmem>>, vector<1x64xf32>
    tpu.vector_store %arg7[%c2_94, %c256_95], %64 {strides = array<i32>} : memref<16x384xf32, #tpu.memory_space<vmem>>, vector<1x64xf32>,
    %c0_96 = arith.constant 0 : index
    %c0_97 = arith.constant 0 : index
    %c5_98 = arith.constant 5 : index
    %c2_99 = arith.constant 2 : index
    %66 = vector.load %arg2[%c0_96, %c0_97, %c5_98, %c2_99] : memref<1x1x6x82xf32, #tpu.memory_space<vmem>>, vector<1x1x1x64xf32>
    %67 = vector.shape_cast %66 : vector<1x1x1x64xf32> to vector<1x64xf32>
    %68 = arith.mulf %67, %45 : vector<1x64xf32>
    %c2_100 = arith.constant 2 : index
    %c320_101 = arith.constant 320 : index
    %69 = vector.load %arg7[%c2_100, %c320_101] : memref<16x384xf32, #tpu.memory_space<vmem>>, vector<1x64xf32>
    tpu.vector_store %arg7[%c2_100, %c320_101], %68 {strides = array<i32>} : memref<16x384xf32, #tpu.memory_space<vmem>>, vector<1x64xf32>,
    %c0_102 = arith.constant 0 : index
    %c0_103 = arith.constant 0 : index
    %70 = vector.load %arg5[%c0_102, %c0_103] : memref<3x64xf32, #tpu.memory_space<vmem>>, vector<1x64xf32>
    %c0_104 = arith.constant 0 : index
    %c0_105 = arith.constant 0 : index
    %c0_106 = arith.constant 0 : index
    %c8 = arith.constant 8 : index
    %71 = vector.load %arg2[%c0_104, %c0_105, %c0_106, %c8] : memref<1x1x6x82xf32, #tpu.memory_space<vmem>>, vector<1x1x1x64xf32>
    %72 = vector.shape_cast %71 : vector<1x1x1x64xf32> to vector<1x64xf32>
    %73 = arith.mulf %72, %70 : vector<1x64xf32>
    %c3_107 = arith.constant 3 : index
    %c0_108 = arith.constant 0 : index
    %74 = vector.load %arg7[%c3_107, %c0_108] : memref<16x384xf32, #tpu.memory_space<vmem>>, vector<1x64xf32>
    tpu.vector_store %arg7[%c3_107, %c0_108], %73 {strides = array<i32>} : memref<16x384xf32, #tpu.memory_space<vmem>>, vector<1x64xf32>,
    %c0_109 = arith.constant 0 : index
    %c0_110 = arith.constant 0 : index
    %c1_111 = arith.constant 1 : index
    %c8_112 = arith.constant 8 : index
    %75 = vector.load %arg2[%c0_109, %c0_110, %c1_111, %c8_112] : memref<1x1x6x82xf32, #tpu.memory_space<vmem>>, vector<1x1x1x64xf32>
    %76 = vector.shape_cast %75 : vector<1x1x1x64xf32> to vector<1x64xf32>
    %77 = arith.mulf %76, %70 : vector<1x64xf32>
    %c3_113 = arith.constant 3 : index
    %c64_114 = arith.constant 64 : index
    %78 = vector.load %arg7[%c3_113, %c64_114] : memref<16x384xf32, #tpu.memory_space<vmem>>, vector<1x64xf32>
    tpu.vector_store %arg7[%c3_113, %c64_114], %77 {strides = array<i32>} : memref<16x384xf32, #tpu.memory_space<vmem>>, vector<1x64xf32>,
    %c0_115 = arith.constant 0 : index
    %c0_116 = arith.constant 0 : index
    %c2_117 = arith.constant 2 : index
    %c8_118 = arith.constant 8 : index
    %79 = vector.load %arg2[%c0_115, %c0_116, %c2_117, %c8_118] : memref<1x1x6x82xf32, #tpu.memory_space<vmem>>, vector<1x1x1x64xf32>
    %80 = vector.shape_cast %79 : vector<1x1x1x64xf32> to vector<1x64xf32>
    %81 = arith.mulf %80, %70 : vector<1x64xf32>
    %c3_119 = arith.constant 3 : index
    %c128_120 = arith.constant 128 : index
    %82 = vector.load %arg7[%c3_119, %c128_120] : memref<16x384xf32, #tpu.memory_space<vmem>>, vector<1x64xf32>
    tpu.vector_store %arg7[%c3_119, %c128_120], %81 {strides = array<i32>} : memref<16x384xf32, #tpu.memory_space<vmem>>, vector<1x64xf32>,
    %c0_121 = arith.constant 0 : index
    %c0_122 = arith.constant 0 : index
    %c3_123 = arith.constant 3 : index
    %c8_124 = arith.constant 8 : index
    %83 = vector.load %arg2[%c0_121, %c0_122, %c3_123, %c8_124] : memref<1x1x6x82xf32, #tpu.memory_space<vmem>>, vector<1x1x1x64xf32>
    %84 = vector.shape_cast %83 : vector<1x1x1x64xf32> to vector<1x64xf32>
    %85 = arith.mulf %84, %70 : vector<1x64xf32>
    %c3_125 = arith.constant 3 : index
    %c192_126 = arith.constant 192 : index
    %86 = vector.load %arg7[%c3_125, %c192_126] : memref<16x384xf32, #tpu.memory_space<vmem>>, vector<1x64xf32>
    tpu.vector_store %arg7[%c3_125, %c192_126], %85 {strides = array<i32>} : memref<16x384xf32, #tpu.memory_space<vmem>>, vector<1x64xf32>,
    %c0_127 = arith.constant 0 : index
    %c0_128 = arith.constant 0 : index
    %c4_129 = arith.constant 4 : index
    %c8_130 = arith.constant 8 : index
    %87 = vector.load %arg2[%c0_127, %c0_128, %c4_129, %c8_130] : memref<1x1x6x82xf32, #tpu.memory_space<vmem>>, vector<1x1x1x64xf32>
    %88 = vector.shape_cast %87 : vector<1x1x1x64xf32> to vector<1x64xf32>
    %89 = arith.mulf %88, %70 : vector<1x64xf32>
    %c3_131 = arith.constant 3 : index
    %c256_132 = arith.constant 256 : index
    %90 = vector.load %arg7[%c3_131, %c256_132] : memref<16x384xf32, #tpu.memory_space<vmem>>, vector<1x64xf32>
    tpu.vector_store %arg7[%c3_131, %c256_132], %89 {strides = array<i32>} : memref<16x384xf32, #tpu.memory_space<vmem>>, vector<1x64xf32>,
    %c0_133 = arith.constant 0 : index
    %c0_134 = arith.constant 0 : index
    %c5_135 = arith.constant 5 : index
    %c8_136 = arith.constant 8 : index
    %91 = vector.load %arg2[%c0_133, %c0_134, %c5_135, %c8_136] : memref<1x1x6x82xf32, #tpu.memory_space<vmem>>, vector<1x1x1x64xf32>
    %92 = vector.shape_cast %91 : vector<1x1x1x64xf32> to vector<1x64xf32>
    %93 = arith.mulf %92, %70 : vector<1x64xf32>
    %c3_137 = arith.constant 3 : index
    %c320_138 = arith.constant 320 : index
    %94 = vector.load %arg7[%c3_137, %c320_138] : memref<16x384xf32, #tpu.memory_space<vmem>>, vector<1x64xf32>
    tpu.vector_store %arg7[%c3_137, %c320_138], %93 {strides = array<i32>} : memref<16x384xf32, #tpu.memory_space<vmem>>, vector<1x64xf32>,
    %c0_139 = arith.constant 0 : index
    %c0_140 = arith.constant 0 : index
    %c0_141 = arith.constant 0 : index
    %c9_142 = arith.constant 9 : index
    %95 = vector.load %arg2[%c0_139, %c0_140, %c0_141, %c9_142] : memref<1x1x6x82xf32, #tpu.memory_space<vmem>>, vector<1x1x1x64xf32>
    %96 = vector.shape_cast %95 : vector<1x1x1x64xf32> to vector<1x64xf32>
    %c4_143 = arith.constant 4 : index
    %c0_144 = arith.constant 0 : index
    %97 = vector.load %arg7[%c4_143, %c0_144] : memref<16x384xf32, #tpu.memory_space<vmem>>, vector<1x64xf32>
    tpu.vector_store %arg7[%c4_143, %c0_144], %96 {strides = array<i32>} : memref<16x384xf32, #tpu.memory_space<vmem>>, vector<1x64xf32>,
    %c0_145 = arith.constant 0 : index
    %c0_146 = arith.constant 0 : index
    %c1_147 = arith.constant 1 : index
    %c9_148 = arith.constant 9 : index
    %98 = vector.load %arg2[%c0_145, %c0_146, %c1_147, %c9_148] : memref<1x1x6x82xf32, #tpu.memory_space<vmem>>, vector<1x1x1x64xf32>
    %99 = vector.shape_cast %98 : vector<1x1x1x64xf32> to vector<1x64xf32>
    %c4_149 = arith.constant 4 : index
    %c64_150 = arith.constant 64 : index
    %100 = vector.load %arg7[%c4_149, %c64_150] : memref<16x384xf32, #tpu.memory_space<vmem>>, vector<1x64xf32>
    tpu.vector_store %arg7[%c4_149, %c64_150], %99 {strides = array<i32>} : memref<16x384xf32, #tpu.memory_space<vmem>>, vector<1x64xf32>,
    %c0_151 = arith.constant 0 : index
    %c0_152 = arith.constant 0 : index
    %c2_153 = arith.constant 2 : index
    %c9_154 = arith.constant 9 : index
    %101 = vector.load %arg2[%c0_151, %c0_152, %c2_153, %c9_154] : memref<1x1x6x82xf32, #tpu.memory_space<vmem>>, vector<1x1x1x64xf32>
    %102 = vector.shape_cast %101 : vector<1x1x1x64xf32> to vector<1x64xf32>
    %c4_155 = arith.constant 4 : index
    %c128_156 = arith.constant 128 : index
    %103 = vector.load %arg7[%c4_155, %c128_156] : memref<16x384xf32, #tpu.memory_space<vmem>>, vector<1x64xf32>
    tpu.vector_store %arg7[%c4_155, %c128_156], %102 {strides = array<i32>} : memref<16x384xf32, #tpu.memory_space<vmem>>, vector<1x64xf32>,
    %c0_157 = arith.constant 0 : index
    %c0_158 = arith.constant 0 : index
    %c3_159 = arith.constant 3 : index
    %c9_160 = arith.constant 9 : index
    %104 = vector.load %arg2[%c0_157, %c0_158, %c3_159, %c9_160] : memref<1x1x6x82xf32, #tpu.memory_space<vmem>>, vector<1x1x1x64xf32>
    %105 = vector.shape_cast %104 : vector<1x1x1x64xf32> to vector<1x64xf32>
    %c4_161 = arith.constant 4 : index
    %c192_162 = arith.constant 192 : index
    %106 = vector.load %arg7[%c4_161, %c192_162] : memref<16x384xf32, #tpu.memory_space<vmem>>, vector<1x64xf32>
    tpu.vector_store %arg7[%c4_161, %c192_162], %105 {strides = array<i32>} : memref<16x384xf32, #tpu.memory_space<vmem>>, vector<1x64xf32>,
    %c0_163 = arith.constant 0 : index
    %c0_164 = arith.constant 0 : index
    %c4_165 = arith.constant 4 : index
    %c9_166 = arith.constant 9 : index
    %107 = vector.load %arg2[%c0_163, %c0_164, %c4_165, %c9_166] : memref<1x1x6x82xf32, #tpu.memory_space<vmem>>, vector<1x1x1x64xf32>
    %108 = vector.shape_cast %107 : vector<1x1x1x64xf32> to vector<1x64xf32>
    %c4_167 = arith.constant 4 : index
    %c256_168 = arith.constant 256 : index
    %109 = vector.load %arg7[%c4_167, %c256_168] : memref<16x384xf32, #tpu.memory_space<vmem>>, vector<1x64xf32>
    tpu.vector_store %arg7[%c4_167, %c256_168], %108 {strides = array<i32>} : memref<16x384xf32, #tpu.memory_space<vmem>>, vector<1x64xf32>,
    %c0_169 = arith.constant 0 : index
    %c0_170 = arith.constant 0 : index
    %c5_171 = arith.constant 5 : index
    %c9_172 = arith.constant 9 : index
    %110 = vector.load %arg2[%c0_169, %c0_170, %c5_171, %c9_172] : memref<1x1x6x82xf32, #tpu.memory_space<vmem>>, vector<1x1x1x64xf32>
    %111 = vector.shape_cast %110 : vector<1x1x1x64xf32> to vector<1x64xf32>
    %c4_173 = arith.constant 4 : index
    %c320_174 = arith.constant 320 : index
    %112 = vector.load %arg7[%c4_173, %c320_174] : memref<16x384xf32, #tpu.memory_space<vmem>>, vector<1x64xf32>
    tpu.vector_store %arg7[%c4_173, %c320_174], %111 {strides = array<i32>} : memref<16x384xf32, #tpu.memory_space<vmem>>, vector<1x64xf32>,
    %c2_175 = arith.constant 2 : index
    %c0_176 = arith.constant 0 : index
    %113 = vector.load %arg5[%c2_175, %c0_176] : memref<3x64xf32, #tpu.memory_space<vmem>>, vector<1x64xf32>
    %c0_177 = arith.constant 0 : index
    %c0_178 = arith.constant 0 : index
    %c0_179 = arith.constant 0 : index
    %c10 = arith.constant 10 : index
    %114 = vector.load %arg2[%c0_177, %c0_178, %c0_179, %c10] : memref<1x1x6x82xf32, #tpu.memory_space<vmem>>, vector<1x1x1x64xf32>
    %115 = vector.shape_cast %114 : vector<1x1x1x64xf32> to vector<1x64xf32>
    %116 = arith.mulf %115, %113 : vector<1x64xf32>
    %c5_180 = arith.constant 5 : index
    %c0_181 = arith.constant 0 : index
    %117 = vector.load %arg7[%c5_180, %c0_181] : memref<16x384xf32, #tpu.memory_space<vmem>>, vector<1x64xf32>
    tpu.vector_store %arg7[%c5_180, %c0_181], %116 {strides = array<i32>} : memref<16x384xf32, #tpu.memory_space<vmem>>, vector<1x64xf32>,
    %c0_182 = arith.constant 0 : index
    %c0_183 = arith.constant 0 : index
    %c1_184 = arith.constant 1 : index
    %c10_185 = arith.constant 10 : index
    %118 = vector.load %arg2[%c0_182, %c0_183, %c1_184, %c10_185] : memref<1x1x6x82xf32, #tpu.memory_space<vmem>>, vector<1x1x1x64xf32>
    %119 = vector.shape_cast %118 : vector<1x1x1x64xf32> to vector<1x64xf32>
    %120 = arith.mulf %119, %113 : vector<1x64xf32>
    %c5_186 = arith.constant 5 : index
    %c64_187 = arith.constant 64 : index
    %121 = vector.load %arg7[%c5_186, %c64_187] : memref<16x384xf32, #tpu.memory_space<vmem>>, vector<1x64xf32>
    tpu.vector_store %arg7[%c5_186, %c64_187], %120 {strides = array<i32>} : memref<16x384xf32, #tpu.memory_space<vmem>>, vector<1x64xf32>,
    %c0_188 = arith.constant 0 : index
    %c0_189 = arith.constant 0 : index
    %c2_190 = arith.constant 2 : index
    %c10_191 = arith.constant 10 : index
    %122 = vector.load %arg2[%c0_188, %c0_189, %c2_190, %c10_191] : memref<1x1x6x82xf32, #tpu.memory_space<vmem>>, vector<1x1x1x64xf32>
    %123 = vector.shape_cast %122 : vector<1x1x1x64xf32> to vector<1x64xf32>
    %124 = arith.mulf %123, %113 : vector<1x64xf32>
    %c5_192 = arith.constant 5 : index
    %c128_193 = arith.constant 128 : index
    %125 = vector.load %arg7[%c5_192, %c128_193] : memref<16x384xf32, #tpu.memory_space<vmem>>, vector<1x64xf32>
    tpu.vector_store %arg7[%c5_192, %c128_193], %124 {strides = array<i32>} : memref<16x384xf32, #tpu.memory_space<vmem>>, vector<1x64xf32>,
    %c0_194 = arith.constant 0 : index
    %c0_195 = arith.constant 0 : index
    %c3_196 = arith.constant 3 : index
    %c10_197 = arith.constant 10 : index
    %126 = vector.load %arg2[%c0_194, %c0_195, %c3_196, %c10_197] : memref<1x1x6x82xf32, #tpu.memory_space<vmem>>, vector<1x1x1x64xf32>
    %127 = vector.shape_cast %126 : vector<1x1x1x64xf32> to vector<1x64xf32>
    %128 = arith.mulf %127, %113 : vector<1x64xf32>
    %c5_198 = arith.constant 5 : index
    %c192_199 = arith.constant 192 : index
    %129 = vector.load %arg7[%c5_198, %c192_199] : memref<16x384xf32, #tpu.memory_space<vmem>>, vector<1x64xf32>
    tpu.vector_store %arg7[%c5_198, %c192_199], %128 {strides = array<i32>} : memref<16x384xf32, #tpu.memory_space<vmem>>, vector<1x64xf32>,
    %c0_200 = arith.constant 0 : index
    %c0_201 = arith.constant 0 : index
    %c4_202 = arith.constant 4 : index
    %c10_203 = arith.constant 10 : index
    %130 = vector.load %arg2[%c0_200, %c0_201, %c4_202, %c10_203] : memref<1x1x6x82xf32, #tpu.memory_space<vmem>>, vector<1x1x1x64xf32>
    %131 = vector.shape_cast %130 : vector<1x1x1x64xf32> to vector<1x64xf32>
    %132 = arith.mulf %131, %113 : vector<1x64xf32>
    %c5_204 = arith.constant 5 : index
    %c256_205 = arith.constant 256 : index
    %133 = vector.load %arg7[%c5_204, %c256_205] : memref<16x384xf32, #tpu.memory_space<vmem>>, vector<1x64xf32>
    tpu.vector_store %arg7[%c5_204, %c256_205], %132 {strides = array<i32>} : memref<16x384xf32, #tpu.memory_space<vmem>>, vector<1x64xf32>,
    %c0_206 = arith.constant 0 : index
    %c0_207 = arith.constant 0 : index
    %c5_208 = arith.constant 5 : index
    %c10_209 = arith.constant 10 : index
    %134 = vector.load %arg2[%c0_206, %c0_207, %c5_208, %c10_209] : memref<1x1x6x82xf32, #tpu.memory_space<vmem>>, vector<1x1x1x64xf32>
    %135 = vector.shape_cast %134 : vector<1x1x1x64xf32> to vector<1x64xf32>
    %136 = arith.mulf %135, %113 : vector<1x64xf32>
    %c5_210 = arith.constant 5 : index
    %c320_211 = arith.constant 320 : index
    %137 = vector.load %arg7[%c5_210, %c320_211] : memref<16x384xf32, #tpu.memory_space<vmem>>, vector<1x64xf32>
    tpu.vector_store %arg7[%c5_210, %c320_211], %136 {strides = array<i32>} : memref<16x384xf32, #tpu.memory_space<vmem>>, vector<1x64xf32>,
    %c0_212 = arith.constant 0 : index
    %c0_213 = arith.constant 0 : index
    %138 = vector.load %arg5[%c0_212, %c0_213] : memref<3x64xf32, #tpu.memory_space<vmem>>, vector<1x64xf32>
    %c0_214 = arith.constant 0 : index
    %c0_215 = arith.constant 0 : index
    %c0_216 = arith.constant 0 : index
    %c16 = arith.constant 16 : index
    %139 = vector.load %arg2[%c0_214, %c0_215, %c0_216, %c16] : memref<1x1x6x82xf32, #tpu.memory_space<vmem>>, vector<1x1x1x64xf32>
    %140 = vector.shape_cast %139 : vector<1x1x1x64xf32> to vector<1x64xf32>
    %141 = arith.mulf %140, %138 : vector<1x64xf32>
    %c6 = arith.constant 6 : index
    %c0_217 = arith.constant 0 : index
    %142 = vector.load %arg7[%c6, %c0_217] : memref<16x384xf32, #tpu.memory_space<vmem>>, vector<1x64xf32>
    tpu.vector_store %arg7[%c6, %c0_217], %141 {strides = array<i32>} : memref<16x384xf32, #tpu.memory_space<vmem>>, vector<1x64xf32>,
    %c0_218 = arith.constant 0 : index
    %c0_219 = arith.constant 0 : index
    %c1_220 = arith.constant 1 : index
    %c16_221 = arith.constant 16 : index
    %143 = vector.load %arg2[%c0_218, %c0_219, %c1_220, %c16_221] : memref<1x1x6x82xf32, #tpu.memory_space<vmem>>, vector<1x1x1x64xf32>
    %144 = vector.shape_cast %143 : vector<1x1x1x64xf32> to vector<1x64xf32>
    %145 = arith.mulf %144, %138 : vector<1x64xf32>
    %c6_222 = arith.constant 6 : index
    %c64_223 = arith.constant 64 : index
    %146 = vector.load %arg7[%c6_222, %c64_223] : memref<16x384xf32, #tpu.memory_space<vmem>>, vector<1x64xf32>
    tpu.vector_store %arg7[%c6_222, %c64_223], %145 {strides = array<i32>} : memref<16x384xf32, #tpu.memory_space<vmem>>, vector<1x64xf32>,
    %c0_224 = arith.constant 0 : index
    %c0_225 = arith.constant 0 : index
    %c2_226 = arith.constant 2 : index
    %c16_227 = arith.constant 16 : index
    %147 = vector.load %arg2[%c0_224, %c0_225, %c2_226, %c16_227] : memref<1x1x6x82xf32, #tpu.memory_space<vmem>>, vector<1x1x1x64xf32>
    %148 = vector.shape_cast %147 : vector<1x1x1x64xf32> to vector<1x64xf32>
    %149 = arith.mulf %148, %138 : vector<1x64xf32>
    %c6_228 = arith.constant 6 : index
    %c128_229 = arith.constant 128 : index
    %150 = vector.load %arg7[%c6_228, %c128_229] : memref<16x384xf32, #tpu.memory_space<vmem>>, vector<1x64xf32>
    tpu.vector_store %arg7[%c6_228, %c128_229], %149 {strides = array<i32>} : memref<16x384xf32, #tpu.memory_space<vmem>>, vector<1x64xf32>,
    %c0_230 = arith.constant 0 : index
    %c0_231 = arith.constant 0 : index
    %c3_232 = arith.constant 3 : index
    %c16_233 = arith.constant 16 : index
    %151 = vector.load %arg2[%c0_230, %c0_231, %c3_232, %c16_233] : memref<1x1x6x82xf32, #tpu.memory_space<vmem>>, vector<1x1x1x64xf32>
    %152 = vector.shape_cast %151 : vector<1x1x1x64xf32> to vector<1x64xf32>
    %153 = arith.mulf %152, %138 : vector<1x64xf32>
    %c6_234 = arith.constant 6 : index
    %c192_235 = arith.constant 192 : index
    %154 = vector.load %arg7[%c6_234, %c192_235] : memref<16x384xf32, #tpu.memory_space<vmem>>, vector<1x64xf32>
    tpu.vector_store %arg7[%c6_234, %c192_235], %153 {strides = array<i32>} : memref<16x384xf32, #tpu.memory_space<vmem>>, vector<1x64xf32>,
    %c0_236 = arith.constant 0 : index
    %c0_237 = arith.constant 0 : index
    %c4_238 = arith.constant 4 : index
    %c16_239 = arith.constant 16 : index
    %155 = vector.load %arg2[%c0_236, %c0_237, %c4_238, %c16_239] : memref<1x1x6x82xf32, #tpu.memory_space<vmem>>, vector<1x1x1x64xf32>
    %156 = vector.shape_cast %155 : vector<1x1x1x64xf32> to vector<1x64xf32>
    %157 = arith.mulf %156, %138 : vector<1x64xf32>
    %c6_240 = arith.constant 6 : index
    %c256_241 = arith.constant 256 : index
    %158 = vector.load %arg7[%c6_240, %c256_241] : memref<16x384xf32, #tpu.memory_space<vmem>>, vector<1x64xf32>
    tpu.vector_store %arg7[%c6_240, %c256_241], %157 {strides = array<i32>} : memref<16x384xf32, #tpu.memory_space<vmem>>, vector<1x64xf32>,
    %c0_242 = arith.constant 0 : index
    %c0_243 = arith.constant 0 : index
    %c5_244 = arith.constant 5 : index
    %c16_245 = arith.constant 16 : index
    %159 = vector.load %arg2[%c0_242, %c0_243, %c5_244, %c16_245] : memref<1x1x6x82xf32, #tpu.memory_space<vmem>>, vector<1x1x1x64xf32>
    %160 = vector.shape_cast %159 : vector<1x1x1x64xf32> to vector<1x64xf32>
    %161 = arith.mulf %160, %138 : vector<1x64xf32>
    %c6_246 = arith.constant 6 : index
    %c320_247 = arith.constant 320 : index
    %162 = vector.load %arg7[%c6_246, %c320_247] : memref<16x384xf32, #tpu.memory_space<vmem>>, vector<1x64xf32>
    tpu.vector_store %arg7[%c6_246, %c320_247], %161 {strides = array<i32>} : memref<16x384xf32, #tpu.memory_space<vmem>>, vector<1x64xf32>,
    %c0_248 = arith.constant 0 : index
    %c0_249 = arith.constant 0 : index
    %c0_250 = arith.constant 0 : index
    %c17 = arith.constant 17 : index
    %163 = vector.load %arg2[%c0_248, %c0_249, %c0_250, %c17] : memref<1x1x6x82xf32, #tpu.memory_space<vmem>>, vector<1x1x1x64xf32>
    %164 = vector.shape_cast %163 : vector<1x1x1x64xf32> to vector<1x64xf32>
    %c7 = arith.constant 7 : index
    %c0_251 = arith.constant 0 : index
    %165 = vector.load %arg7[%c7, %c0_251] : memref<16x384xf32, #tpu.memory_space<vmem>>, vector<1x64xf32>
    tpu.vector_store %arg7[%c7, %c0_251], %164 {strides = array<i32>} : memref<16x384xf32, #tpu.memory_space<vmem>>, vector<1x64xf32>,
    %c0_252 = arith.constant 0 : index
    %c0_253 = arith.constant 0 : index
    %c1_254 = arith.constant 1 : index
    %c17_255 = arith.constant 17 : index
    %166 = vector.load %arg2[%c0_252, %c0_253, %c1_254, %c17_255] : memref<1x1x6x82xf32, #tpu.memory_space<vmem>>, vector<1x1x1x64xf32>
    %167 = vector.shape_cast %166 : vector<1x1x1x64xf32> to vector<1x64xf32>
    %c7_256 = arith.constant 7 : index
    %c64_257 = arith.constant 64 : index
    %168 = vector.load %arg7[%c7_256, %c64_257] : memref<16x384xf32, #tpu.memory_space<vmem>>, vector<1x64xf32>
    tpu.vector_store %arg7[%c7_256, %c64_257], %167 {strides = array<i32>} : memref<16x384xf32, #tpu.memory_space<vmem>>, vector<1x64xf32>,
    %c0_258 = arith.constant 0 : index
    %c0_259 = arith.constant 0 : index
    %c2_260 = arith.constant 2 : index
    %c17_261 = arith.constant 17 : index
    %169 = vector.load %arg2[%c0_258, %c0_259, %c2_260, %c17_261] : memref<1x1x6x82xf32, #tpu.memory_space<vmem>>, vector<1x1x1x64xf32>
    %170 = vector.shape_cast %169 : vector<1x1x1x64xf32> to vector<1x64xf32>
    %c7_262 = arith.constant 7 : index
    %c128_263 = arith.constant 128 : index
    %171 = vector.load %arg7[%c7_262, %c128_263] : memref<16x384xf32, #tpu.memory_space<vmem>>, vector<1x64xf32>
    tpu.vector_store %arg7[%c7_262, %c128_263], %170 {strides = array<i32>} : memref<16x384xf32, #tpu.memory_space<vmem>>, vector<1x64xf32>,
    %c0_264 = arith.constant 0 : index
    %c0_265 = arith.constant 0 : index
    %c3_266 = arith.constant 3 : index
    %c17_267 = arith.constant 17 : index
    %172 = vector.load %arg2[%c0_264, %c0_265, %c3_266, %c17_267] : memref<1x1x6x82xf32, #tpu.memory_space<vmem>>, vector<1x1x1x64xf32>
    %173 = vector.shape_cast %172 : vector<1x1x1x64xf32> to vector<1x64xf32>
    %c7_268 = arith.constant 7 : index
    %c192_269 = arith.constant 192 : index
    %174 = vector.load %arg7[%c7_268, %c192_269] : memref<16x384xf32, #tpu.memory_space<vmem>>, vector<1x64xf32>
    tpu.vector_store %arg7[%c7_268, %c192_269], %173 {strides = array<i32>} : memref<16x384xf32, #tpu.memory_space<vmem>>, vector<1x64xf32>,
    %c0_270 = arith.constant 0 : index
    %c0_271 = arith.constant 0 : index
    %c4_272 = arith.constant 4 : index
    %c17_273 = arith.constant 17 : index
    %175 = vector.load %arg2[%c0_270, %c0_271, %c4_272, %c17_273] : memref<1x1x6x82xf32, #tpu.memory_space<vmem>>, vector<1x1x1x64xf32>
    %176 = vector.shape_cast %175 : vector<1x1x1x64xf32> to vector<1x64xf32>
    %c7_274 = arith.constant 7 : index
    %c256_275 = arith.constant 256 : index
    %177 = vector.load %arg7[%c7_274, %c256_275] : memref<16x384xf32, #tpu.memory_space<vmem>>, vector<1x64xf32>
    tpu.vector_store %arg7[%c7_274, %c256_275], %176 {strides = array<i32>} : memref<16x384xf32, #tpu.memory_space<vmem>>, vector<1x64xf32>,
    %c0_276 = arith.constant 0 : index
    %c0_277 = arith.constant 0 : index
    %c5_278 = arith.constant 5 : index
    %c17_279 = arith.constant 17 : index
    %178 = vector.load %arg2[%c0_276, %c0_277, %c5_278, %c17_279] : memref<1x1x6x82xf32, #tpu.memory_space<vmem>>, vector<1x1x1x64xf32>
    %179 = vector.shape_cast %178 : vector<1x1x1x64xf32> to vector<1x64xf32>
    %c7_280 = arith.constant 7 : index
    %c320_281 = arith.constant 320 : index
    %180 = vector.load %arg7[%c7_280, %c320_281] : memref<16x384xf32, #tpu.memory_space<vmem>>, vector<1x64xf32>
    tpu.vector_store %arg7[%c7_280, %c320_281], %179 {strides = array<i32>} : memref<16x384xf32, #tpu.memory_space<vmem>>, vector<1x64xf32>,
    %c2_282 = arith.constant 2 : index
    %c0_283 = arith.constant 0 : index
    %181 = vector.load %arg5[%c2_282, %c0_283] : memref<3x64xf32, #tpu.memory_space<vmem>>, vector<1x64xf32>
    %c0_284 = arith.constant 0 : index
    %c0_285 = arith.constant 0 : index
    %c0_286 = arith.constant 0 : index
    %c18 = arith.constant 18 : index
    %182 = vector.load %arg2[%c0_284, %c0_285, %c0_286, %c18] : memref<1x1x6x82xf32, #tpu.memory_space<vmem>>, vector<1x1x1x64xf32>
    %183 = vector.shape_cast %182 : vector<1x1x1x64xf32> to vector<1x64xf32>
    %184 = arith.mulf %183, %181 : vector<1x64xf32>
    %c8_287 = arith.constant 8 : index
    %c0_288 = arith.constant 0 : index
    %185 = vector.load %arg7[%c8_287, %c0_288] : memref<16x384xf32, #tpu.memory_space<vmem>>, vector<1x64xf32>
    tpu.vector_store %arg7[%c8_287, %c0_288], %184 {strides = array<i32>} : memref<16x384xf32, #tpu.memory_space<vmem>>, vector<1x64xf32>,
    %c0_289 = arith.constant 0 : index
    %c0_290 = arith.constant 0 : index
    %c1_291 = arith.constant 1 : index
    %c18_292 = arith.constant 18 : index
    %186 = vector.load %arg2[%c0_289, %c0_290, %c1_291, %c18_292] : memref<1x1x6x82xf32, #tpu.memory_space<vmem>>, vector<1x1x1x64xf32>
    %187 = vector.shape_cast %186 : vector<1x1x1x64xf32> to vector<1x64xf32>
    %188 = arith.mulf %187, %181 : vector<1x64xf32>
    %c8_293 = arith.constant 8 : index
    %c64_294 = arith.constant 64 : index
    %189 = vector.load %arg7[%c8_293, %c64_294] : memref<16x384xf32, #tpu.memory_space<vmem>>, vector<1x64xf32>
    tpu.vector_store %arg7[%c8_293, %c64_294], %188 {strides = array<i32>} : memref<16x384xf32, #tpu.memory_space<vmem>>, vector<1x64xf32>,
    %c0_295 = arith.constant 0 : index
    %c0_296 = arith.constant 0 : index
    %c2_297 = arith.constant 2 : index
    %c18_298 = arith.constant 18 : index
    %190 = vector.load %arg2[%c0_295, %c0_296, %c2_297, %c18_298] : memref<1x1x6x82xf32, #tpu.memory_space<vmem>>, vector<1x1x1x64xf32>
    %191 = vector.shape_cast %190 : vector<1x1x1x64xf32> to vector<1x64xf32>
    %192 = arith.mulf %191, %181 : vector<1x64xf32>
    %c8_299 = arith.constant 8 : index
    %c128_300 = arith.constant 128 : index
    %193 = vector.load %arg7[%c8_299, %c128_300] : memref<16x384xf32, #tpu.memory_space<vmem>>, vector<1x64xf32>
    tpu.vector_store %arg7[%c8_299, %c128_300], %192 {strides = array<i32>} : memref<16x384xf32, #tpu.memory_space<vmem>>, vector<1x64xf32>,
    %c0_301 = arith.constant 0 : index
    %c0_302 = arith.constant 0 : index
    %c3_303 = arith.constant 3 : index
    %c18_304 = arith.constant 18 : index
    %194 = vector.load %arg2[%c0_301, %c0_302, %c3_303, %c18_304] : memref<1x1x6x82xf32, #tpu.memory_space<vmem>>, vector<1x1x1x64xf32>
    %195 = vector.shape_cast %194 : vector<1x1x1x64xf32> to vector<1x64xf32>
    %196 = arith.mulf %195, %181 : vector<1x64xf32>
    %c8_305 = arith.constant 8 : index
    %c192_306 = arith.constant 192 : index
    %197 = vector.load %arg7[%c8_305, %c192_306] : memref<16x384xf32, #tpu.memory_space<vmem>>, vector<1x64xf32>
    tpu.vector_store %arg7[%c8_305, %c192_306], %196 {strides = array<i32>} : memref<16x384xf32, #tpu.memory_space<vmem>>, vector<1x64xf32>,
    %c0_307 = arith.constant 0 : index
    %c0_308 = arith.constant 0 : index
    %c4_309 = arith.constant 4 : index
    %c18_310 = arith.constant 18 : index
    %198 = vector.load %arg2[%c0_307, %c0_308, %c4_309, %c18_310] : memref<1x1x6x82xf32, #tpu.memory_space<vmem>>, vector<1x1x1x64xf32>
    %199 = vector.shape_cast %198 : vector<1x1x1x64xf32> to vector<1x64xf32>
    %200 = arith.mulf %199, %181 : vector<1x64xf32>
    %c8_311 = arith.constant 8 : index
    %c256_312 = arith.constant 256 : index
    %201 = vector.load %arg7[%c8_311, %c256_312] : memref<16x384xf32, #tpu.memory_space<vmem>>, vector<1x64xf32>
    tpu.vector_store %arg7[%c8_311, %c256_312], %200 {strides = array<i32>} : memref<16x384xf32, #tpu.memory_space<vmem>>, vector<1x64xf32>,
    %c0_313 = arith.constant 0 : index
    %c0_314 = arith.constant 0 : index
    %c5_315 = arith.constant 5 : index
    %c18_316 = arith.constant 18 : index
    %202 = vector.load %arg2[%c0_313, %c0_314, %c5_315, %c18_316] : memref<1x1x6x82xf32, #tpu.memory_space<vmem>>, vector<1x1x1x64xf32>
    %203 = vector.shape_cast %202 : vector<1x1x1x64xf32> to vector<1x64xf32>
    %204 = arith.mulf %203, %181 : vector<1x64xf32>
    %c8_317 = arith.constant 8 : index
    %c320_318 = arith.constant 320 : index
    %205 = vector.load %arg7[%c8_317, %c320_318] : memref<16x384xf32, #tpu.memory_space<vmem>>, vector<1x64xf32>
    tpu.vector_store %arg7[%c8_317, %c320_318], %204 {strides = array<i32>} : memref<16x384xf32, #tpu.memory_space<vmem>>, vector<1x64xf32>,
    %c0_319 = arith.constant 0 : index
    %c0_320 = arith.constant 0 : index
    %c0_321 = arith.constant 0 : index
    %206 = vector.load %arg3[%c0_319, %c0_320, %c0_321] : memref<3x32x16xf32, #tpu.memory_space<vmem>>, vector<1x32x16xf32>
    %207 = vector.shape_cast %206 : vector<1x32x16xf32> to vector<32x16xf32>
    %c0_322 = arith.constant 0 : index
    %c0_323 = arith.constant 0 : index
    %208 = vector.load %arg7[%c0_322, %c0_323] : memref<16x384xf32, #tpu.memory_space<vmem>>, vector<16x256xf32>
    %cst_324 = arith.constant dense<0.000000e+00> : vector<32x256xf32>
    %209 = tpu.matmul %207, %208, %cst_324 {dimension_numbers = #tpu.dot_dimension_numbers<[1], [0], [0], [1], [0, 0, 1, 1], [], []>, precision = #tpu.contract_precision<fp32>} : vector<32x16xf32>, vector<16x256xf32>, vector<32x256xf32> -> vector<32x256xf32>
    %c1_325 = arith.constant 1 : index
    %c0_326 = arith.constant 0 : index
    %c0_327 = arith.constant 0 : index
    %210 = vector.load %arg3[%c1_325, %c0_326, %c0_327] : memref<3x32x16xf32, #tpu.memory_space<vmem>>, vector<1x32x16xf32>
    %211 = vector.shape_cast %210 : vector<1x32x16xf32> to vector<32x16xf32>
    %c0_328 = arith.constant 0 : index
    %c64_329 = arith.constant 64 : index
    %212 = vector.load %arg7[%c0_328, %c64_329] : memref<16x384xf32, #tpu.memory_space<vmem>>, vector<16x256xf32>
    %cst_330 = arith.constant dense<0.000000e+00> : vector<32x256xf32>
    %213 = tpu.matmul %211, %212, %cst_330 {dimension_numbers = #tpu.dot_dimension_numbers<[1], [0], [0], [1], [0, 0, 1, 1], [], []>, precision = #tpu.contract_precision<fp32>} : vector<32x16xf32>, vector<16x256xf32>, vector<32x256xf32> -> vector<32x256xf32>
    %214 = arith.addf %209, %213 : vector<32x256xf32>
    %c2_331 = arith.constant 2 : index
    %c0_332 = arith.constant 0 : index
    %c0_333 = arith.constant 0 : index
    %215 = vector.load %arg3[%c2_331, %c0_332, %c0_333] : memref<3x32x16xf32, #tpu.memory_space<vmem>>, vector<1x32x16xf32>
    %216 = vector.shape_cast %215 : vector<1x32x16xf32> to vector<32x16xf32>
    %c0_334 = arith.constant 0 : index
    %c128_335 = arith.constant 128 : index
    %217 = vector.load %arg7[%c0_334, %c128_335] : memref<16x384xf32, #tpu.memory_space<vmem>>, vector<16x256xf32>
    %cst_336 = arith.constant dense<0.000000e+00> : vector<32x256xf32>
    %218 = tpu.matmul %216, %217, %cst_336 {dimension_numbers = #tpu.dot_dimension_numbers<[1], [0], [0], [1], [0, 0, 1, 1], [], []>, precision = #tpu.contract_precision<fp32>} : vector<32x16xf32>, vector<16x256xf32>, vector<32x256xf32> -> vector<32x256xf32>
    %219 = arith.addf %214, %218 : vector<32x256xf32>
    %c0_337 = arith.constant 0 : index
    %c0_338 = arith.constant 0 : index
    %220 = vector.load %arg4[%c0_337, %c0_338] : memref<32x1xf32, #tpu.memory_space<vmem>>, vector<32x1xf32>
    %221 = vector.broadcast %220 : vector<32x1xf32> to vector<32x256xf32>
    %222 = arith.addf %219, %221 : vector<32x256xf32>
    %cst_339 = arith.constant 0.000000e+00 : f32
    %223 = vector.broadcast %cst_339 : f32 to vector<32x256xf32>
    %224 = arith.maximumf %222, %223 : vector<32x256xf32>
    %c0_340 = arith.constant 0 : index
    %c0_341 = arith.constant 0 : index
    %c0_342 = arith.constant 0 : index
    %225 = vector.load %arg6[%c0_340, %c0_341, %c0_342] : memref<1x32x256xf32, #tpu.memory_space<vmem>>, vector<1x32x256xf32>
    %226 = vector.shape_cast %225 : vector<1x32x256xf32> to vector<32x256xf32>
    %227 = vector.shape_cast %224 : vector<32x256xf32> to vector<1x32x256xf32>
    tpu.vector_store %arg6[%c0_340, %c0_341, %c0_342], %227 {strides = array<i32>} : memref<1x32x256xf32, #tpu.memory_space<vmem>>, vector<1x32x256xf32>,
    return
  }
  func.func @transform_0(%arg0: i32, %arg1: i32) -> (i32, i32, i32, i32) {
    %c0_i32 = arith.constant 0 : i32
    %c0_i32_0 = arith.constant 0 : i32
    %c0_i32_1 = arith.constant 0 : i32
    return %arg0, %arg1, %c0_i32, %c0_i32_0 : i32, i32, i32, i32
  }
  func.func @transform_1(%arg0: i32, %arg1: i32) -> (i32, i32, i32) {
    %c0_i32 = arith.constant 0 : i32
    %c0_i32_0 = arith.constant 0 : i32
    %c0_i32_1 = arith.constant 0 : i32
    %c0_i32_2 = arith.constant 0 : i32
    return %c0_i32, %c0_i32_0, %c0_i32_1 : i32, i32, i32
  }
  func.func @transform_2(%arg0: i32, %arg1: i32) -> (i32, i32) {
    %c0_i32 = arith.constant 0 : i32
    %c0_i32_0 = arith.constant 0 : i32
    %c0_i32_1 = arith.constant 0 : i32
    return %c0_i32, %c0_i32_0 : i32, i32
  }
  func.func @transform_3(%arg0: i32, %arg1: i32) -> (i32, i32) {
    %c0_i32 = arith.constant 0 : i32
    %c0_i32_0 = arith.constant 0 : i32
    %c0_i32_1 = arith.constant 0 : i32
    return %c0_i32, %c0_i32_0 : i32, i32
  }
  func.func @transform_4(%arg0: i32, %arg1: i32) -> (i32, i32, i32) {
    %c0_i32 = arith.constant 0 : i32
    %c0_i32_0 = arith.constant 0 : i32
    return %arg0, %c0_i32, %arg1 : i32, i32, i32
  }
}

</mosaic_0001>

<bundles_post_ra>
// kernel: initial_conv_block.1
= control target key start
LH: loop header
LB: loop body
LE: loop exit
PB: predicated region body
PF: predicated region fallthrough
CT: control target
= control target key end

     0   :  { %s3186_s15 = smov 0   ;;  %s3188_s16 = smov 0   ;;  %s3960_s0 = inlined_call_operand.vmem [shape: f32[2,2,6,82], index: 0, kind: input, shape index: {}]   ;;  %s3961_s1 = inlined_call_operand.vmem [shape: f32[3,32,16], index: 1, kind: input, shape index: {}]   ;;  %s3962_s2 = inlined_call_operand.vmem [shape: f32[32,1], index: 2, kind: input, shape index: {}]   ;;  %s3963_s3 = inlined_call_operand.vmem [shape: f32[3,64], index: 3, kind: input, shape index: {}]   ;;  %s3964_s4 = inlined_call_operand.vmem [shape: f32[2,32,512], index: 4, kind: output, shape index: {}]  }
   0x1   :  { %s3190_s17 = smov 0   ;;  %s3192_s18 = smov 0  }
   0x2   :  { %s3194_s19 = smov 0   ;;  %s3196_s20 = smov 0  }
   0x3   :  { %s3198_s21 = smov 0  }
   0x4 LB: > { %s23_s22 = sadd.s32 1, %s3127_s19  ;;  %s26_s23 = sadd.s32 1, %s3131_s20  ;;  %s3135_s21 = sphi %s3198_s21, %s14_s21   ;;  %s3131_s20 = sphi %s3196_s20, %s3971_s20   ;;  %s3127_s19 = sphi %s3194_s19, %s3970_s19   ;;  %s3123_s18 = sphi %s3192_s18, %s3969_s18   ;;  %s3119_s17 = sphi %s3190_s17, %s3968_s17   ;;  %s3115_s16 = sphi %s3188_s16, %s3967_s16   ;;  %s3111_s15 = sphi %s3186_s15, %s3966_s15  }
   0x5   : > { %p24_p0 = scmp.ge.s32.totalorder %s23_s22, 2  ;;  %s2769_s24 = sadd.s32 4294967295, %s3135_s21  }
   0x6   : > { %p136_p1 = scmp.ne.s32.totalorder %s3115_s16, %s3111_s15  ;;  %p137_p2 = scmp.eq.s32.totalorder %s2769_s24, 3 }
   0x7   : > { %s3973_s22 = smov (%p24_p0, %s23_s22), 0  ;;  %s3975_s23 = smov (!%p24_p0, %s26_s23), %s3131_s20 }
   0x8   : > { %s122_s25 = ssub.s32 %s3127_s19, %s3973_s22  ;;  %p28_p3 = scmp.ge.s32.totalorder %s3975_s23, 2 }
   0x9   : > { %p2773_p4 = scmp.ge.s32.totalorder %s3135_s21, 1  ;;  %p3232_p5 = por %p137_p2, %p136_p1 }
   0xa   : > { %p181_p6 = scmp.lt.s32.totalorder %s3135_s21, 5  ;;  %s3977_s23 = smov (%p28_p3, %s3975_s23), 0 }
   0xb   : > { %s121_s27 = ssub.s32 %s3131_s20, %s3977_s23  ;;  %s126_s29 = sadd.s32 1, %s3115_s16 }
   0xc   : > { %p182_p7 = pnand %p2773_p4, %p181_p6  ;;  %s123_s28 = sor.u32 %s122_s25, %s121_s27 }
   0xd   : > { %p124_p8 = scmp.eq.s32.totalorder %s123_s28, 0  ;;  %v290_v0 = vld [vmem:[%s3963_s3 + $0x2] sm:$0x1] (!%p182_p7)  ;;  %s3137_s7 = smov (!%p182_p7), 2   ;;  %v337_v2 = vld [vmem:[%s3963_s3] sm:$0x1] (!%p182_p7) }
   0xe   : > { %185 = sbr.rel (%p182_p7) target bundleno = 805 (0x325), region = 36  ;;  %293 = vrot.lane.b32.xlu0 (!%p182_p7), %v290_v0, %s3137_s7  ;;  %v420_v1 = vld [vmem:[%s3963_s3 + $0x2] sm:$0x1] (!%p182_p7)  ;;  %s3138_s12 = smov (!%p182_p7), 10   ;;  %v467_v3 = vld [vmem:[%s3963_s3] sm:$0x1] (!%p182_p7) }
   0xf   : > { %s3243_s30 = scalar_select %p124_p8, %s3115_s16, %s126_s29  }
  0x10   : > { %423 = vrot.lane.b32.xlu1 (!%p182_p7), %v420_v1, %s3138_s12  ;;  %p209_p9 = scmp.lt.s32.totalorder (!%p182_p7), %s3123_s18, 1  ;;  %p211_p10 = scmp.lt.s32.totalorder (!%p182_p7), %s3119_s17, 1  ;;  %v550_v4 = vld [vmem:[%s3963_s3 + $0x2] sm:$0x1] (!%p182_p7)  ;;  %v221_v9 = vld [vmem:[%s3963_s3] sm:$0x1] (!%p182_p7) }
  0x11   : > { %s3139_s25 = smov (!%p182_p7), 8   ;;  %s3140_s28 = smov (!%p182_p7), 16   ;;  %vm224_vm0 = vcmask (!%p182_p7), 516096   ;;  %vm232_vm1 = vcmask (!%p182_p7), 1040896   ;;  %vm643_vm2 = vcmask (!%p182_p7), 130048   ;;  %vm634_vm3 = vcmask (!%p182_p7), 523264  }
  0x12   : > { %340 = vrot.lane.b32.xlu0 (!%p182_p7), %v337_v2, %s3139_s25  ;;  %s3141_s9 = smov (!%p182_p7), 18   ;;  %s3142_s13 = smov (!%p182_p7), 127  }
  0x13   : > { %s3143_s14 = smov (!%p182_p7), 119   ;;  %s3146_s29 = smov (!%p182_p7), 63  }
  0x14   : > { %470 = vrot.lane.b32.xlu1 (!%p182_p7), %v467_v3, %s3140_s28  ;;  %s3145_s28 = smov (!%p182_p7), 64   ;;  %s3147_s5 = smov (!%p182_p7), 55  }
  0x15   : > { %s210_s24 = scalar_select %p209_p9, %s3123_s18, 1 }
  0x16   : > { %s212_s27 = scalar_select %p211_p10, %s3119_s17, 1  ;;  %553 = vrot.lane.b32.xlu0 %v550_v4, %s3141_s9 }
  0x17   : > { %s2775_s6 = sshll.u32 %s210_s24, 1  ;;  %s3151_s9 = smov 118  }
  0x18   : > { %s214_s7 = sadd.s32 %s2775_s6, %s212_s27  ;;  %s3144_s27 = smov 111  }
  0x19   : > { %s2776_s8 = sshll.u32 %s214_s7, 3  ;;  %s3148_s6 = smov 47  }
  0x1a   : > { %s3267_s12 = scalar_lea.vmem %s3960_s0, %s2776_s8  ;;  %s3149_s7 = smov 126  }
  0x1b   : > { %v266_v5 = vld [vmem:[%s3267_s12 + $0x2] sm:$0x1]  ;;  %v278_v6 = vld [vmem:[%s3267_s12 + $0x4] sm:$0x1]  ;;  %v237_v11 = vld [vmem:[%s3267_s12 + $0x3] sm:$0x1] }
  0x1c   : > { %268 = vrot.lane.b32.xlu1 %v266_v5, %s3142_s13  ;;  %v396_v7 = vld [vmem:[%s3267_s12 + $0x2] sm:$0x1]  ;;  %280 = vrot.lane.b32.xlu0 %v278_v6, %s3142_s13  ;;  %v408_v8 = vld [vmem:[%s3267_s12 + $0x4] sm:$0x1]  ;;  %v238_v14 = vmul.f32 %v237_v11, %v221_v9  ;;  %s3150_s8 = smov 120   ;;  %s3152_s10 = smov 112  }
  0x1d   : > { %v526_v10 = vld [vmem:[%s3267_s12 + $0x2] sm:$0x1]  ;;  %v538_v12 = vld [vmem:[%s3267_s12 + $0x4] sm:$0x1]  ;;  %v247_v13 = vld [vmem:[%s3267_s12 + $0x5] sm:$0x1] }
  0x1e   : > { %v248_v15 = vmul.f32 %v247_v13, %v221_v9  ;;  %v254_v16 = vld [vmem:[%s3267_s12] sm:$0x1]  ;;  %v272_v17 = vld [vmem:[%s3267_s12 + $0x3] sm:$0x1]  ;;  %v284_v18 = vld [vmem:[%s3267_s12 + $0x5] sm:$0x1] }
  0x1f   : > { %v384_v19 = vld [vmem:[%s3267_s12] sm:$0x1]  ;;  %v402_v20 = vld [vmem:[%s3267_s12 + $0x3] sm:$0x1]  ;;  %v414_v21 = vld [vmem:[%s3267_s12 + $0x5] sm:$0x1] }
  0x20   : > { %398 = vrot.lane.b32.xlu1 %v396_v7, %s3143_s14  ;;  %410 = vrot.lane.b32.xlu0 %v408_v8, %s3143_s14  ;;  %v514_v22 = vld [vmem:[%s3267_s12] sm:$0x1]  ;;  %v532_v23 = vld [vmem:[%s3267_s12 + $0x3] sm:$0x1]  ;;  %s3153_s11 = smov 110   ;;  %s3156_s24 = smov 54  }
  0x21   : > { %v544_v24 = vld [vmem:[%s3267_s12 + $0x5] sm:$0x1]  ;;  %v226_v25 = vld [vmem:[%s3267_s12 + $0x1] sm:$0x1]  ;;  %v234_v29 = vld [vmem:[%s3267_s12 + $0x2] sm:$0x1] }
  0x22   : > { %v260_v26 = vld [vmem:[%s3267_s12 + $0x1] sm:$0x1]  ;;  %v227_v27 = vmul.f32 %v226_v25, %v221_v9  ;;  %v244_v30 = vld [vmem:[%s3267_s12 + $0x4] sm:$0x1]  ;;  %v235_v31 = vmul.f32 %v234_v29, %v221_v9  ;;  %v222_v33 = vld [vmem:[%s3267_s12] sm:$0x1] }
  0x23   : > { %v390_v28 = vld [vmem:[%s3267_s12 + $0x1] sm:$0x1]  ;;  %v245_v32 = vmul.f32 %v244_v30, %v221_v9  ;;  %v223_v34 = vmul.f32 %v222_v33, %v221_v9  ;;  %v323_v35 = vld [vmem:[%s3267_s12 + $0x4] sm:$0x1]  ;;  %v309_v36 = vld [vmem:[%s3267_s12 + $0x2] sm:$0x1] }
  0x24   : > { %528 = vrot.lane.b32.xlu1 %v526_v10, %s3144_s27  ;;  %540 = vrot.lane.b32.xlu0 %v538_v12, %s3144_s27  ;;  %236 = vst.msk [vmem:[#allocation2 + $0x8] sm:$0x1] %vm224_vm0, %v235_v31  ;;  %v370_v41 = vld [vmem:[%s3267_s12 + $0x4] sm:$0x1]  ;;  %v356_v42 = vld [vmem:[%s3267_s12 + $0x2] sm:$0x1] }
  0x25   : > { %246 = vst.msk [vmem:[#allocation2 + $0x10] sm:$0x1] %vm224_vm0, %v245_v32  ;;  %225 = vst.msk [vmem:[#allocation2] sm:$0x1] %vm224_vm0, %v223_v34  ;;  %v453_v44 = vld [vmem:[%s3267_s12 + $0x4] sm:$0x1] }
  0x26   : > { %v439_v45 = vld [vmem:[%s3267_s12 + $0x2] sm:$0x1]  ;;  %v500_v51 = vld [vmem:[%s3267_s12 + $0x4] sm:$0x1]  ;;  %v291_v0 = vld [vmem:[%s3267_s12] sm:$0x1] }
  0x27   : > { %v486_v52 = vld [vmem:[%s3267_s12 + $0x2] sm:$0x1]  ;;  %v583_v57 = vld [vmem:[%s3267_s12 + $0x4] sm:$0x1]  ;;  %v316_v1 = vld [vmem:[%s3267_s12 + $0x3] sm:$0x1] }
  0x28   : > { %240 = vrot.lane.b32.xlu1 %v238_v14, %s3145_s28  ;;  %250 = vrot.lane.b32.xlu0 %v248_v15, %s3145_s28  ;;  %v569_v58 = vld [vmem:[%s3267_s12 + $0x2] sm:$0x1]  ;;  %v330_v6 = vld [vmem:[%s3267_s12 + $0x5] sm:$0x1]  ;;  %s3158_s25 = smov 48  }
  0x29   : > { %v338_v7 = vld [vmem:[%s3267_s12] sm:$0x1]  ;;  %v363_v12 = vld [vmem:[%s3267_s12 + $0x3] sm:$0x1]  ;;  %v377_v13 = vld [vmem:[%s3267_s12 + $0x5] sm:$0x1] }
  0x2a   : > { %v460_v25 = vld [vmem:[%s3267_s12 + $0x5] sm:$0x1]  ;;  %v493_v32 = vld [vmem:[%s3267_s12 + $0x3] sm:$0x1] }
  0x2b   : > { %v507_v31 = vld [vmem:[%s3267_s12 + $0x5] sm:$0x1] }
  0x2c   : > { %256 = vrot.lane.b32.xlu1 %v254_v16, %s3142_s13  ;;  %274 = vrot.lane.b32.xlu0 %v272_v17, %s3146_s29  ;;  %s3154_s13 = smov 62  }
  0x30   : > { %286 = vrot.lane.b32.xlu1 %v284_v18, %s3146_s29  ;;  %386 = vrot.lane.b32.xlu0 %v384_v19, %s3143_s14  ;;  %v446_v18 = vld [vmem:[%s3267_s12 + $0x3] sm:$0x1]  ;;  %v421_v19 = vld [vmem:[%s3267_s12] sm:$0x1]  ;;  %s3155_s14 = smov 56  }
  0x34   : > { %404 = vrot.lane.b32.xlu1 %v402_v20, %s3147_s5  ;;  %416 = vrot.lane.b32.xlu0 %v414_v21, %s3147_s5 }
  0x38   : > { %516 = vrot.lane.b32.xlu1 %v514_v22, %s3144_s27  ;;  %534 = vrot.lane.b32.xlu0 %v532_v23, %s3148_s6  ;;  %s3159_s27 = smov 46  }
  0x3c   : > { %546 = vrot.lane.b32.xlu1 %v544_v24, %s3148_s6  ;;  %262 = vrot.lane.b32.xlu0 %v260_v26, %s3146_s29  ;;  %v468_v24 = vld [vmem:[%s3267_s12] sm:$0x1] }
  0x40   : > { %229 = vrot.lane.b32.xlu1 %v227_v27, %s3145_s28 }
  0x44   : > { %392 = vrot.lane.b32.xlu1 %v390_v28, %s3147_s5  ;;  %v3157_v28 = vmov 0.0   ;;  %s206_s5 = sand.u32 1, %s3111_s15   ;;  %s2786_s15 = sshll.u32 (%p3232_p5), %s3119_s17, 1 }
  0x45   : > { %219 = vst [vmem:[#allocation2 + $0x20] sm:$0xfe] %v3157_v28  ;;  %218 = vst [vmem:[#allocation2 + $0x18] sm:$0xfe] %v3157_v28  ;;  %1705 = vmatprep.mubr.f32.mxu0 %v3157_v28  ;;  %724 = vmatprep.mubr.f32.mxu1 %v3157_v28 }
  0x46   : > { %220 = vst [vmem:[#allocation2 + $0x28] sm:$0xfe] %v3157_v28 }
  0x80   : > { %v3305_v37 = vpop.permute.xlu0 %293 }
  0x81   : > { %v324_v38 = vmul.f32 %v323_v35, %v3305_v37  ;;  %v310_v39 = vmul.f32 %v309_v36, %v3305_v37  ;;  %v296_v4 = vmul.f32 %v3305_v37, %v291_v0  ;;  %v317_v5 = vmul.f32 %v316_v1, %v3305_v37 }
  0x82   : > { %v3309_v40 = vpop.permute.xlu1 %423  ;;  %v331_v10 = vmul.f32 %v330_v6, %v3305_v37 }
  0x83   : > { %326 = vrot.lane.b32.xlu0 %v324_v38, %s3149_s7  ;;  %312 = vrot.lane.b32.xlu1 %v310_v39, %s3149_s7  ;;  %v454_v49 = vmul.f32 %v453_v44, %v3309_v40  ;;  %v440_v50 = vmul.f32 %v439_v45, %v3309_v40  ;;  %v447_v22 = vmul.f32 %v446_v18, %v3309_v40  ;;  %v551_v38 = vld [vmem:[%s3267_s12] sm:$0x1]  ;;  %v576_v39 = vld [vmem:[%s3267_s12 + $0x3] sm:$0x1] }
  0x84   : > { %v3315_v43 = vpop.permute.xlu0 %340  ;;  %v426_v23 = vmul.f32 %v3309_v40, %v421_v19  ;;  %v461_v30 = vmul.f32 %v460_v25, %v3309_v40 }
  0x85   : > { %v371_v46 = vmul.f32 %v370_v41, %v3315_v43  ;;  %v357_v47 = vmul.f32 %v356_v42, %v3315_v43  ;;  %v343_v11 = vmul.f32 %v3315_v43, %v338_v7  ;;  %v364_v16 = vmul.f32 %v363_v12, %v3315_v43 }
  0x86   : > { %v3321_v48 = vpop.permute.xlu1 %470  ;;  %v378_v17 = vmul.f32 %v377_v13, %v3315_v43 }
  0x87   : > { %373 = vrot.lane.b32.xlu0 %v371_v46, %s3150_s8  ;;  %359 = vrot.lane.b32.xlu1 %v357_v47, %s3150_s8  ;;  %v501_v55 = vmul.f32 %v500_v51, %v3321_v48  ;;  %v487_v56 = vmul.f32 %v486_v52, %v3321_v48  ;;  %v473_v29 = vmul.f32 %v3321_v48, %v468_v24  ;;  %v590_v46 = vld [vmem:[%s3267_s12 + $0x5] sm:$0x1]  ;;  %v302_v47 = vld [vmem:[%s3267_s12 + $0x1] sm:$0x1] }
  0x88   : > { %v3329_v53 = vpop.permute.xlu0 %553  ;;  %v508_v35 = vmul.f32 %v507_v31, %v3321_v48  ;;  %v494_v36 = vmul.f32 %v493_v32, %v3321_v48  ;;  %v303_v51 = vmul.f32 %v302_v47, %v3305_v37  ;;  %v349_v52 = vld [vmem:[%s3267_s12 + $0x1] sm:$0x1] }
  0x89   : > { %v584_v61 = vmul.f32 %v583_v57, %v3329_v53  ;;  %v570_v62 = vmul.f32 %v569_v58, %v3329_v53  ;;  %v556_v44 = vmul.f32 %v3329_v53, %v551_v38  ;;  %v577_v45 = vmul.f32 %v576_v39, %v3329_v53  ;;  %v432_v58 = vld [vmem:[%s3267_s12 + $0x1] sm:$0x1] }
  0x8a   : > { %v433_v37 = vmul.f32 %v432_v58, %v3309_v40 }
  0x8b   : > { %456 = vrot.lane.b32.xlu0 %v454_v49, %s3151_s9  ;;  %442 = vrot.lane.b32.xlu1 %v440_v50, %s3151_s9  ;;  %v591_v50 = vmul.f32 %v590_v46, %v3329_v53 }
  0x8e   : > { %v269_v54 = vpop.permute.xlu1 %268  ;;  %v281_v59 = vpop.permute.xlu0 %280 }
  0x8f   : > { %271 = vst.msk [vmem:[#allocation2 + $0x9] sm:$0x1] %vm224_vm0, %v269_v54  ;;  %283 = vst.msk [vmem:[#allocation2 + $0x11] sm:$0x1] %vm224_vm0, %v281_v59  ;;  %503 = vrot.lane.b32.xlu0 %v501_v55, %s3152_s10  ;;  %489 = vrot.lane.b32.xlu1 %v487_v56, %s3152_s10  ;;  %v479_v54 = vld [vmem:[%s3267_s12 + $0x1] sm:$0x1]  ;;  %v350_v56 = vmul.f32 %v349_v52, %v3315_v43 }
  0x90   : > { %v480_v57 = vmul.f32 %v479_v54, %v3321_v48  ;;  %v562_v59 = vld [vmem:[%s3267_s12 + $0x1] sm:$0x1] }
  0x92   : > { %v399_v60 = vpop.permute.xlu1 %398  ;;  %v411_v63 = vpop.permute.xlu0 %410 }
  0x93   : > { %401 = vst.msk [vmem:[#allocation2 + $0xc] sm:$0x1] %vm224_vm0, %v399_v60  ;;  %413 = vst.msk [vmem:[#allocation2 + $0x14] sm:$0x1] %vm224_vm0, %v411_v63  ;;  %586 = vrot.lane.b32.xlu0 %v584_v61, %s3153_s11  ;;  %572 = vrot.lane.b32.xlu1 %v570_v62, %s3153_s11  ;;  %v563_v60 = vmul.f32 %v562_v59, %v3329_v53  ;;  %v520_v61 = vld [vmem:[%s3267_s12 + $0x1] sm:$0x1] }
  0x94   : > { %v600_v59 = vld [vmem:[%s3961_s1 + $0x18] sm:$0xff] }
  0x96   : > { %v529_v2 = vpop.permute.xlu1 %528  ;;  %v541_v3 = vpop.permute.xlu0 %540 }
  0x97   : > { %531 = vst.msk [vmem:[#allocation2 + $0xf] sm:$0x1] %vm224_vm0, %v529_v2  ;;  %543 = vst.msk [vmem:[#allocation2 + $0x17] sm:$0x1] %vm224_vm0, %v541_v3  ;;  %298 = vrot.lane.b32.xlu0 %v296_v4, %s3149_s7  ;;  %319 = vrot.lane.b32.xlu1 %v317_v5, %s3154_s13 }
  0x9a   : > { %v241_v8 = vpop.permute.xlu1 %240  ;;  %v251_v9 = vpop.permute.xlu0 %250 }
  0x9b   : > { %243 = vst.msk [vmem:[#allocation2 + $0x8] sm:$0x1] %vm232_vm1, %v241_v8  ;;  %253 = vst.msk [vmem:[#allocation2 + $0x10] sm:$0x1] %vm232_vm1, %v251_v9  ;;  %333 = vrot.lane.b32.xlu0 %v331_v10, %s3154_s13  ;;  %345 = vrot.lane.b32.xlu1 %v343_v11, %s3150_s8  ;;  %s2787_s8 = sshll.u32 (%p3232_p5), %s3123_s18, 4 }
  0x9e   : > { %v257_v14 = vpop.permute.xlu1 %256  ;;  %v275_v15 = vpop.permute.xlu0 %274 }
  0x9f   : > { %259 = vst.msk [vmem:[#allocation2 + $0x1] sm:$0x1] %vm224_vm0, %v257_v14  ;;  %366 = vrot.lane.b32.xlu0 %v364_v16, %s3155_s14  ;;  %380 = vrot.lane.b32.xlu1 %v378_v17, %s3155_s14 }
  0xa0   : > { %277 = vst.msk [vmem:[#allocation2 + $0x9] sm:$0x1] %vm232_vm1, %v275_v15 }
  0xa2   : > { %v287_v20 = vpop.permute.xlu1 %286  ;;  %v387_v21 = vpop.permute.xlu0 %386 }
  0xa3   : > { %289 = vst.msk [vmem:[#allocation2 + $0x11] sm:$0x1] %vm232_vm1, %v287_v20  ;;  %449 = vrot.lane.b32.xlu0 %v447_v22, %s3156_s24  ;;  %428 = vrot.lane.b32.xlu1 %v426_v23, %s3151_s9  ;;  %s2664_s9 = sadd.s32 (%p3232_p5), %s2787_s8, %s2786_s15 }
  0xa4   : > { %389 = vst.msk [vmem:[#allocation2 + $0x4] sm:$0x1] %vm224_vm0, %v387_v21  ;;  %s2788_s26 = sshll.u32 (%p3232_p5), %s2664_s9, 3 }
  0xa6   : > { %v405_v26 = vpop.permute.xlu1 %404  ;;  %v417_v27 = vpop.permute.xlu0 %416 }
  0xa7   : > { %407 = vst.msk [vmem:[#allocation2 + $0xc] sm:$0x1] %vm232_vm1, %v405_v26  ;;  %419 = vst.msk [vmem:[#allocation2 + $0x14] sm:$0x1] %vm232_vm1, %v417_v27  ;;  %475 = vrot.lane.b32.xlu0 %v473_v29, %s3152_s10  ;;  %463 = vrot.lane.b32.xlu1 %v461_v30, %s3156_s24 }
  0xaa   : > { %v517_v33 = vpop.permute.xlu1 %516  ;;  %v535_v34 = vpop.permute.xlu0 %534 }
  0xab   : > { %519 = vst.msk [vmem:[#allocation2 + $0x7] sm:$0x1] %vm224_vm0, %v517_v33  ;;  %510 = vrot.lane.b32.xlu0 %v508_v35, %s3158_s25  ;;  %496 = vrot.lane.b32.xlu1 %v494_v36, %s3158_s25  ;;  %v597_v36 = vld [vmem:[%s3961_s1] sm:$0xff] }
  0xac   : > { %537 = vst.msk [vmem:[#allocation2 + $0xf] sm:$0x1] %vm232_vm1, %v535_v34 }
  0xae   : > { %v547_v41 = vpop.permute.xlu1 %546  ;;  %v263_v42 = vpop.permute.xlu0 %262 }
  0xaf   : > { %549 = vst.msk [vmem:[#allocation2 + $0x17] sm:$0x1] %vm232_vm1, %v547_v41  ;;  %265 = vst.msk [vmem:[#allocation2 + $0x1] sm:$0x1] %vm232_vm1, %v263_v42  ;;  %558 = vrot.lane.b32.xlu0 %v556_v44, %s3153_s11  ;;  %579 = vrot.lane.b32.xlu1 %v577_v45, %s3159_s27  ;;  %v1295_v42 = vsel %vm643_vm2, %v597_v36, 0  ;;  %v598_v44 = vld [vmem:[%s3961_s1 + $0x8] sm:$0xff]  ;;  %s2666_s11 = scalar_lea.vmem (%p3232_p5), %s3964_s4, %s2788_s26 }
  0xb0   : > { %v3491_v46 = vand.u32 4294901760, %v1295_v42 }
  0xb2   : > { %v230_v49 = vpop.permute.xlu1 %229  ;;  %v3501_v54 = vsub.f32 %v1295_v42, %v3491_v46  ;;  %v2784_v42 = vld [vmem:[%s3961_s1 + $0x58] sm:$0xff] }
  0xb3   : > { %233 = vst.msk [vmem:[#allocation2] sm:$0x1] %vm232_vm1, %v230_v49  ;;  %593 = vrot.lane.b32.xlu0 %v591_v50, %s3159_s27  ;;  %305 = vrot.lane.b32.xlu1 %v303_v51, %s3154_s13  ;;  %v1298_v49 = vsel %vm643_vm2, %v598_v44, 0  ;;  %v599_v50 = vld [vmem:[%s3961_s1 + $0x10] sm:$0xff] }
  0xb4   : > { %v1301_v58 = vsel %vm643_vm2, %v599_v50, 0 }
  0xb6   : > { %v393_v55 = vpop.permute.xlu1 %392 }
  0xb7   : > { %395 = vst.msk [vmem:[#allocation2 + $0x4] sm:$0x1] %vm232_vm1, %v393_v55  ;;  %352 = vrot.lane.b32.xlu0 %v350_v56, %s3155_s14  ;;  %482 = vrot.lane.b32.xlu1 %v480_v57, %s3158_s25  ;;  %v3503_v55 = vand.u32 4294901760, %v1298_v49 }
  0xbb   : > { %435 = vrot.lane.b32.xlu0 %v433_v37, %s3156_s24  ;;  %565 = vrot.lane.b32.xlu1 %v563_v60, %s3159_s27 }
  0xbf   : > { %522 = vrot.lane.b32.xlu0 %v520_v61, %s3148_s6  ;;  %s2774_s6 = sshll.u32 %s206_s5, 6 }
  0xc0   : > { %s3914_s7 = scalar_lea.vmem [#allocation3], %s2774_s6 }
  0xf5   : > { %v327_v62 = vpop.permute.xlu0 %326  ;;  %v313_v63 = vpop.permute.xlu1 %312 }
  0xf6   : > { %329 = vst.msk [vmem:[#allocation2 + $0x12] sm:$0x1] %vm224_vm0, %v327_v62  ;;  %315 = vst.msk [vmem:[#allocation2 + $0xa] sm:$0x1] %vm224_vm0, %v313_v63  ;;  %v1377_v62 = vand.u32 4294901760, %v3501_v54  ;;  %v3518_v63 = vsub.f32 %v1298_v49, %v3503_v55  ;;  %v1959_v49 = vsel %vm643_vm2, %v2784_v42, 0 }
  0xf9   : > { %v374_v43 = vpop.permute.xlu0 %373  ;;  %v360_v48 = vpop.permute.xlu1 %359 }
  0xfa   : > { %376 = vst.msk [vmem:[#allocation2 + $0x13] sm:$0x1] %vm224_vm0, %v374_v43  ;;  %362 = vst.msk [vmem:[#allocation2 + $0xb] sm:$0x1] %vm224_vm0, %v360_v48  ;;  %v3520_v43 = vand.u32 4294901760, %v1301_v58 }
  0xfd   : > { %v457_v40 = vpop.permute.xlu0 %456  ;;  %v443_v53 = vpop.permute.xlu1 %442 }
  0xfe   : > { %459 = vst.msk [vmem:[#allocation2 + $0x15] sm:$0x1] %vm224_vm0, %v457_v40  ;;  %445 = vst.msk [vmem:[#allocation2 + $0xd] sm:$0x1] %vm224_vm0, %v443_v53  ;;  %v1304_v40 = vsel %vm643_vm2, %v600_v59, 0 }
 0x101   : > { %v504_v0 = vpop.permute.xlu0 %503  ;;  %v490_v1 = vpop.permute.xlu1 %489 }
 0x102   : > { %506 = vst.msk [vmem:[#allocation2 + $0x16] sm:$0x1] %vm224_vm0, %v504_v0  ;;  %492 = vst.msk [vmem:[#allocation2 + $0xe] sm:$0x1] %vm224_vm0, %v490_v1 }
 0x105   : > { %v587_v2 = vpop.permute.xlu0 %586  ;;  %v573_v3 = vpop.permute.xlu1 %572 }
 0x106   : > { %589 = vst.msk [vmem:[#allocation2 + $0x28] sm:$0x1] %vm224_vm0, %v587_v2  ;;  %575 = vst.msk [vmem:[#allocation2 + $0x20] sm:$0x1] %vm224_vm0, %v573_v3  ;;  %v1388_v2 = vand.u32 4294901760, %v3518_v63  ;;  %v3533_v3 = vsub.f32 %v1301_v58, %v3520_v43  ;;  %v3628_v58 = vand.u32 4294901760, %v1959_v49 }
 0x109   : > { %v299_v4 = vpop.permute.xlu0 %298  ;;  %v320_v5 = vpop.permute.xlu1 %319 }
 0x10a   : > { %301 = vst.msk [vmem:[#allocation2 + $0x2] sm:$0x1] %vm224_vm0, %v299_v4  ;;  %v3535_v4 = vand.u32 4294901760, %v1304_v40 }
 0x10b   : > { %322 = vst.msk [vmem:[#allocation2 + $0xa] sm:$0x1] %vm232_vm1, %v320_v5 }
 0x10d   : > { %v334_v6 = vpop.permute.xlu0 %333  ;;  %v346_v7 = vpop.permute.xlu1 %345 }
 0x10e   : > { %336 = vst.msk [vmem:[#allocation2 + $0x12] sm:$0x1] %vm232_vm1, %v334_v6 }
 0x10f   : > { %348 = vst.msk [vmem:[#allocation2 + $0x3] sm:$0x1] %vm224_vm0, %v346_v7 }
 0x111   : > { %v367_v8 = vpop.permute.xlu0 %366  ;;  %v381_v9 = vpop.permute.xlu1 %380 }
 0x112   : > { %369 = vst.msk [vmem:[#allocation2 + $0xb] sm:$0x1] %vm232_vm1, %v367_v8  ;;  %383 = vst.msk [vmem:[#allocation2 + $0x13] sm:$0x1] %vm232_vm1, %v381_v9  ;;  %v1399_v8 = vand.u32 4294901760, %v3533_v3  ;;  %v3545_v9 = vsub.f32 %v1304_v40, %v3535_v4  ;;  %v3640_v40 = vsub.f32 %v1959_v49, %v3628_v58  ;;  %v2779_v49 = vld [vmem:[%s3961_s1 + $0x30] sm:$0xff] }
 0x115   : > { %v450_v10 = vpop.permute.xlu0 %449  ;;  %v429_v11 = vpop.permute.xlu1 %428 }
 0x116   : > { %452 = vst.msk [vmem:[#allocation2 + $0xd] sm:$0x1] %vm232_vm1, %v450_v10  ;;  %v1410_v10 = vand.u32 4294901760, %v3545_v9 }
 0x117   : > { %431 = vst.msk [vmem:[#allocation2 + $0x5] sm:$0x1] %vm224_vm0, %v429_v11 }
 0x119   : > { %v476_v12 = vpop.permute.xlu0 %475  ;;  %v464_v13 = vpop.permute.xlu1 %463 }
 0x11a   : > { %478 = vst.msk [vmem:[#allocation2 + $0x6] sm:$0x1] %vm224_vm0, %v476_v12 }
 0x11b   : > { %466 = vst.msk [vmem:[#allocation2 + $0x15] sm:$0x1] %vm232_vm1, %v464_v13 }
 0x11d   : > { %v511_v14 = vpop.permute.xlu0 %510  ;;  %v497_v15 = vpop.permute.xlu1 %496 }
 0x11e   : > { %513 = vst.msk [vmem:[#allocation2 + $0x16] sm:$0x1] %vm232_vm1, %v511_v14  ;;  %499 = vst.msk [vmem:[#allocation2 + $0xe] sm:$0x1] %vm232_vm1, %v497_v15 }
 0x121   : > { %v559_v16 = vpop.permute.xlu0 %558  ;;  %v580_v17 = vpop.permute.xlu1 %579 }
 0x122   : > { %561 = vst.msk [vmem:[#allocation2 + $0x18] sm:$0x1] %vm224_vm0, %v559_v16 }
 0x123   : > { %582 = vst.msk [vmem:[#allocation2 + $0x20] sm:$0x1] %vm232_vm1, %v580_v17 }
 0x125   : > { %v594_v18 = vpop.permute.xlu0 %593  ;;  %v306_v19 = vpop.permute.xlu1 %305  ;;  %v3448_v20 = vld [vmem:[#allocation2 + $0x10] sm:$0xff]  ;;  %v611_v21 = vld [vmem:[#allocation2 + $0x8] sm:$0xff] }
 0x126   : > { %596 = vst.msk [vmem:[#allocation2 + $0x28] sm:$0x1] %vm232_vm1, %v594_v18  ;;  %308 = vst.msk [vmem:[#allocation2 + $0x2] sm:$0x1] %vm232_vm1, %v306_v19  ;;  %626 = vrot.lane.b32.xlu1 %v3448_v20, %s3145_s28  ;;  %624 = vrot.lane.b32.xlu0 %v611_v21, %s3145_s28  ;;  %v1963_v22 = vand.u32 4294901760, %v611_v21  ;;  %v1961_v12 = vand.u32 4294901760, %v3448_v20 }
 0x127   : > { %v2781_v18 = vld [vmem:[%s3961_s1 + $0x40] sm:$0xff] }
 0x128   : > { %v3458_v27 = vsub.f32 %v611_v21, %v1963_v22  ;;  %v3566_v15 = vsub.f32 %v3448_v20, %v1961_v12  ;;  %v1950_v20 = vsel %vm643_vm2, %v2781_v18, 0 }
 0x129   : > { %v353_v23 = vpop.permute.xlu0 %352  ;;  %v483_v24 = vpop.permute.xlu1 %482 }
 0x12a   : > { %v614_v25 = vld [vmem:[#allocation2 + $0x20] sm:$0xff]  ;;  %355 = vst.msk [vmem:[#allocation2 + $0x3] sm:$0x1] %vm232_vm1, %v353_v23  ;;  %485 = vst.msk [vmem:[#allocation2 + $0x6] sm:$0x1] %vm232_vm1, %v483_v24  ;;  %v2082_v35 = vand.u32 4294901760, %v3458_v27 }
 0x12b   : > { %630 = vrot.lane.b32.xlu0 %v614_v25, %s3145_s28  ;;  %v1967_v26 = vand.u32 4294901760, %v614_v25  ;;  %v2076_v17 = vand.u32 4294901760, %v3566_v15  ;;  %v3589_v24 = vand.u32 4294901760, %v1950_v20 }
 0x12c   : > { %v2083_v59 = vsub.f32 %v3458_v27, %v2082_v35 }
 0x12d   : > { %v3460_v29 = vpack.c.bf16 %v1967_v26, %v1963_v22  ;;  %v3462_v30 = vsub.f32 %v614_v25, %v1967_v26  ;;  %v436_v31 = vpop.permute.xlu0 %435  ;;  %v566_v32 = vpop.permute.xlu1 %565  ;;  %v3464_v33 = vld [vmem:[#allocation2 + $0x28] sm:$0xff]  ;;  %v2077_v21 = vsub.f32 %v3566_v15, %v2076_v17 }
 0x12e   : > { %438 = vst.msk [vmem:[#allocation2 + $0x5] sm:$0x1] %vm232_vm1, %v436_v31  ;;  %568 = vst.msk [vmem:[#allocation2 + $0x18] sm:$0x1] %vm232_vm1, %v566_v32  ;;  %632 = vrot.lane.b32.xlu1 %v3464_v33, %s3145_s28  ;;  %v1965_v11 = vand.u32 4294901760, %v3464_v33  ;;  %v2782_v22 = vld [vmem:[%s3961_s1 + $0x48] sm:$0xff] }
 0x12f   : > { %v2094_v34 = vand.u32 4294901760, %v3462_v30  ;;  %2828 = vmatprep.subr.bf16.mxu0 %v3460_v29  ;;  %v3478_v38 = vpack.c.bf16 %v3462_v30, %v3458_v27  ;;  %v1953_v25 = vsel %vm643_vm2, %v2782_v22, 0  ;;  %v2078_v26 = vand.u32 4294901760, %v2077_v21  ;;  %v2783_v31 = vld [vmem:[%s3961_s1 + $0x50] sm:$0xff] }
 0x130   : > { %v3558_v13 = vsub.f32 %v3464_v33, %v1965_v11  ;;  %v3561_v14 = vpack.c.bf16 %v1965_v11, %v1961_v12  ;;  %v3598_v33 = vsub.f32 %v1950_v20, %v3589_v24  ;;  %v3600_v36 = vand.u32 4294901760, %v1953_v25 }
 0x131   : > { %v523_v39 = vpop.permute.xlu0 %522  ;;  %v3484_v41 = vpack.c.bf16 %v2094_v34, %v2082_v35  ;;  %v2095_v50 = vsub.f32 %v3462_v30, %v2094_v34 }
 0x132   : > { %525 = vst.msk [vmem:[#allocation2 + $0x7] sm:$0x1] %vm232_vm1, %v523_v39  ;;  %v2088_v16 = vand.u32 4294901760, %v3558_v13  ;;  %v1956_v39 = vsel %vm643_vm2, %v2783_v31, 0  ;;  %v2032_v44 = vand.u32 4294901760, %v3598_v33  ;;  %v2847_v27 = vpack.c.bf16 %v3558_v13, %v3566_v15 }
 0x133   : > { %v2096_v30 = vand.u32 4294901760, %v2095_v50 }
 0x134   : > { %v2089_v19 = vsub.f32 %v3558_v13, %v2088_v16  ;;  %v2777_v13 = vld [vmem:[%s3961_s1 + $0x20] sm:$0xff] }
 0x135   : > { %v613_v45 = vld [vmem:[#allocation2 + $0x18] sm:$0xff] }
 0x136   : > { %628 = vrot.lane.b32.xlu1 %v613_v45, %s3145_s28  ;;  %v1312_v47 = vand.u32 4294901760, %v613_v45  ;;  %v2090_v23 = vand.u32 4294901760, %v2089_v19  ;;  %v2855_v19 = vpack.c.bf16 %v2088_v16, %v2076_v17  ;;  %v645_v16 = vsel %vm643_vm2, %v2777_v13, 0  ;;  %v2778_v17 = vld [vmem:[%s3961_s1 + $0x28] sm:$0xff] }
 0x138   : > { %v3498_v51 = vsub.f32 %v613_v45, %v1312_v47  ;;  %v2843_v32 = vpack.c.bf16 %v2090_v23, %v2078_v26  ;;  %v3611_v45 = vsub.f32 %v1953_v25, %v3600_v36  ;;  %v3690_v26 = vand.u32 4294901760, %v645_v16 }
 0x139   : > { %v610_v52 = vld [vmem:[#allocation2] sm:$0xff] }
 0x13a   : > { %622 = vrot.lane.b32.xlu0 %v610_v52, %s3145_s28  ;;  %v1308_v56 = vand.u32 4294901760, %v610_v52  ;;  %v1439_v57 = vand.u32 4294901760, %v3498_v51 }
 0x13c   : > { %v3511_v37 = vpack.c.bf16 %v1312_v47, %v1308_v56  ;;  %v3513_v60 = vsub.f32 %v610_v52, %v1308_v56  ;;  %v1440_v61 = vsub.f32 %v3498_v51, %v1439_v57  ;;  %v3613_v47 = vand.u32 4294901760, %v1956_v39 }
 0x13d   : > { %v2033_v52 = vsub.f32 %v3598_v33, %v2032_v44  ;;  %v2043_v56 = vand.u32 4294901760, %v3611_v45 }
 0x13e   : > { %2830 = vmatpush1.bf16.msra.mxu0 %v3511_v37  ;;  %v1427_v48 = vand.u32 4294901760, %v3513_v60  ;;  %v2825_v53 = vpack.c.bf16 %v3498_v51, %v3513_v60  ;;  %v1441_v6 = vand.u32 4294901760, %v1440_v61 }
 0x13f   : > { %2832 = vmatprep.subr.bf16.mxu0 %v3484_v41  ;;  %v2034_v34 = vand.u32 4294901760, %v2033_v52  ;;  %v2044_v61 = vsub.f32 %v3611_v45, %v2043_v56 }
 0x140   : > { %v2833_v0 = vpack.c.bf16 %v1439_v57, %v1427_v48  ;;  %v1428_v1 = vsub.f32 %v3513_v60, %v1427_v48  ;;  %v3626_v57 = vsub.f32 %v1956_v39, %v3613_v47 }
 0x141   : > { %1709 = vmatmul.mubr.f32.vlgmr.msra.gmra.mrb[0].mxu0 %v1377_v62  ;;  %v2045_v35 = vand.u32 4294901760, %v2044_v61 }
 0x142   : > { %2834 = vmatpush1.bf16.msra.mxu0 %v2833_v0  ;;  %1714 = vmatprep.mubr.f32.mxu0 %v3157_v28  ;;  %v1429_v5 = vand.u32 4294901760, %v1428_v1  ;;  %v2054_v48 = vand.u32 4294901760, %v3626_v57  ;;  %v2084_v0 = vand.u32 4294901760, %v2083_v59 }
 0x143   : > { %2836 = vmatprep.subr.bf16.mxu0 %v3460_v29 }
 0x144   : > { %v3539_v7 = vpack.c.bf16 %v1441_v6, %v1429_v5  ;;  %v3643_v1 = vpack.c.bf16 %v2096_v30, %v2084_v0  ;;  %v2055_v5 = vsub.f32 %v3626_v57, %v2054_v48  ;;  %v2065_v6 = vand.u32 4294901760, %v3640_v40  ;;  %v2780_v30 = vld [vmem:[%s3961_s1 + $0x38] sm:$0xff] }
 0x145   : > { %1718 = vmatmul.mubr.f32.gmra.mrb[2].mxu0 %v1388_v2 }
 0x146   : > { %1723 = vmatprep.mubr.f32.mxu0 %v3157_v28  ;;  %v2056_v11 = vand.u32 4294901760, %v2055_v5  ;;  %v2066_v12 = vsub.f32 %v3640_v40, %v2065_v6  ;;  %v654_v5 = vsel %vm643_vm2, %v2780_v30, 0 }
 0x148   : > { %v2067_v18 = vand.u32 4294901760, %v2066_v12 }
 0x149   : > { %1727 = vmatmul.mubr.f32.gmra.mrb[4].mxu0 %v1399_v8 }
 0x14a   : > { %1732 = vmatprep.mubr.f32.mxu0 %v3157_v28 }
 0x14d   : > { %1736 = vmatmul.mubr.f32.gmra.mrb[6].mxu0 %v1410_v10 }
 0x14e   : > { %1818 = vmatprep.mubr.f32.mxu0 %v3157_v28 }
 0x151   : > { %1820 = vmatmul.mubr.f32.vlgmr.msra.gmra.mrb[0].mxu0 %v3491_v46 }
 0x152   : > { %2838 = vmatpush1.bf16.msra.mxu0 %v3511_v37  ;;  %1825 = vmatprep.mubr.f32.mxu0 %v3157_v28 }
 0x153   : > { %2840 = vmatprep.subr.bf16.mxu0 %v3561_v14 }
 0x155   : > { %1827 = vmatmul.mubr.f32.gmra.mrb[2].mxu0 %v3503_v55 }
 0x156   : > { %1832 = vmatprep.mubr.f32.mxu0 %v3157_v28 }
 0x159   : > { %1834 = vmatmul.mubr.f32.gmra.mrb[4].mxu0 %v3520_v43 }
 0x15a   : > { %1839 = vmatprep.mubr.f32.mxu0 %v3157_v28 }
 0x15d   : > { %1841 = vmatmul.mubr.f32.gmra.mrb[6].mxu0 %v3535_v4 }
 0x15e   : > { %1915 = vmatprep.mubr.f32.mxu0 %v3157_v28 }
 0x161   : > { %1917 = vmatmul.mubr.f32.vlgmr.msra.gmra.mrb[0].mxu0 %v3491_v46 }
 0x162   : > { %2842 = vmatpush1.bf16.msra.mxu0 %v3460_v29  ;;  %1922 = vmatprep.mubr.f32.mxu0 %v3157_v28 }
 0x163   : > { %2844 = vmatprep.subr.bf16.mxu0 %v2843_v32  ;;  %v648_v32 = vsel %vm643_vm2, %v2778_v17, 0 }
 0x165   : > { %1924 = vmatmul.mubr.f32.gmra.mrb[2].mxu0 %v3503_v55 }
 0x166   : > { %1929 = vmatprep.mubr.f32.mxu0 %v3157_v28 }
 0x169   : > { %1931 = vmatmul.mubr.f32.gmra.mrb[4].mxu0 %v3520_v43 }
 0x16a   : > { %1936 = vmatprep.mubr.f32.mxu0 %v3157_v28 }
 0x16d   : > { %1938 = vmatmul.mubr.f32.gmra.mrb[6].mxu0 %v3535_v4 }
 0x16e   : > { %2029 = vmatprep.mubr.f32.mxu0 %v3157_v28 }
 0x171   : > { %2035 = vmatmul.mubr.f32.vlgmr.msra.gmra.mrb[0].mxu0 %v2034_v34 }
 0x172   : > { %2846 = vmatpush1.bf16.msra.mxu0 %v3643_v1  ;;  %2040 = vmatprep.mubr.f32.mxu0 %v3157_v28 }
 0x173   : > { %2848 = vmatprep.subr.bf16.mxu0 %v2847_v27 }
 0x175   : > { %2046 = vmatmul.mubr.f32.gmra.mrb[2].mxu0 %v2045_v35 }
 0x176   : > { %2051 = vmatprep.mubr.f32.mxu0 %v3157_v28 }
 0x179   : > { %2057 = vmatmul.mubr.f32.gmra.mrb[4].mxu0 %v2056_v11 }
 0x17a   : > { %2062 = vmatprep.mubr.f32.mxu0 %v3157_v28 }
 0x17d   : > { %2068 = vmatmul.mubr.f32.gmra.mrb[6].mxu0 %v2067_v18 }
 0x17e   : > { %2158 = vmatprep.mubr.f32.mxu0 %v3157_v28 }
 0x181   : > { %2160 = vmatmul.mubr.f32.vlgmr.msra.gmra.mrb[0].mxu0 %v3589_v24 }
 0x182   : > { %2850 = vmatpush1.bf16.msra.mxu0 %v3478_v38  ;;  %2165 = vmatprep.mubr.f32.mxu0 %v3157_v28 }
 0x183   : > { %2852 = vmatprep.subr.bf16.mxu0 %v3561_v14 }
 0x185   : > { %2167 = vmatmul.mubr.f32.gmra.mrb[2].mxu0 %v3600_v36 }
 0x186   : > { %2172 = vmatprep.mubr.f32.mxu0 %v3157_v28 }
 0x189   : > { %2174 = vmatmul.mubr.f32.gmra.mrb[4].mxu0 %v3613_v47 }
 0x18a   : > { %2179 = vmatprep.mubr.f32.mxu0 %v3157_v28 }
 0x18d   : > { %2181 = vmatmul.mubr.f32.gmra.mrb[6].mxu0 %v3628_v58 }
 0x18e   : > { %2259 = vmatprep.mubr.f32.mxu0 %v3157_v28 }
 0x191   : > { %2262 = vmatmul.mubr.f32.vlgmr.msra.gmra.mrb[0].mxu0 %v3598_v33  ;;  %v3709_v33 = vsub.f32 %v645_v16, %v3690_v26 }
 0x192   : > { %2854 = vmatpush1.bf16.msra.mxu0 %v3460_v29  ;;  %2267 = vmatprep.mubr.f32.mxu0 %v3157_v28 }
 0x193   : > { %2856 = vmatprep.subr.bf16.mxu0 %v2855_v19  ;;  %v727_v61 = vand.u32 4294901760, %v3709_v33 }
 0x195   : > { %2270 = vmatmul.mubr.f32.gmra.mrb[2].mxu0 %v3611_v45 }
 0x196   : > { %2275 = vmatprep.mubr.f32.mxu0 %v3157_v28 }
 0x198   : > { %v625_v20 = vpop.permute.xlu0 %624  ;;  %v627_v21 = vpop.permute.xlu1 %626 }
 0x199   : > { %2278 = vmatmul.mubr.f32.gmra.mrb[4].mxu0 %v3626_v57  ;;  %v636_v15 = vsel %vm634_vm3, %v625_v20, %v627_v21  ;;  %v728_v57 = vsub.f32 %v3709_v33, %v727_v61 }
 0x19a   : > { %2283 = vmatprep.mubr.f32.mxu0 %v3157_v28  ;;  %v656_v22 = vand.u32 4294901760, %v636_v15 }
 0x19c   : > { %v3698_v42 = vsub.f32 %v636_v15, %v656_v22  ;;  %v3752_v15 = vand.u32 4294901760, %v654_v5 }
 0x19d   : > { %2286 = vmatmul.mubr.f32.gmra.mrb[6].mxu0 %v3640_v40  ;;  %v631_v23 = vpop.permute.xlu0 %630 }
 0x19e   : > { %2360 = vmatprep.mubr.f32.mxu0 %v3157_v28  ;;  %v771_v59 = vand.u32 4294901760, %v3698_v42 }
 0x1a0   : > { %v633_v25 = vpop.permute.xlu1 %632  ;;  %v772_v11 = vsub.f32 %v3698_v42, %v771_v59 }
 0x1a1   : > { %v638_v31 = vsel %vm634_vm3, %v631_v23, %v633_v25  ;;  %2364 = vmatmul.mubr.f32.vlgmr.msra.gmra.mrb[0].mxu0 %v2032_v44  ;;  %v3711_v44 = vand.u32 4294901760, %v648_v32 }
 0x1a2   : > { %v660_v39 = vand.u32 4294901760, %v638_v31  ;;  %2858 = vmatpush1.bf16.msra.mxu0 %v3484_v41  ;;  %2369 = vmatprep.mubr.f32.mxu0 %v3157_v28 }
 0x1a3   : > { %2860 = vmatprep.subr.bf16.mxu0 %v3561_v14  ;;  %v651_v14 = vsel %vm643_vm2, %v2779_v49, 0  ;;  %v3725_v45 = vsub.f32 %v648_v32, %v3711_v44  ;;  %v3766_v32 = vsub.f32 %v654_v5, %v3752_v15 }
 0x1a4   : > { %v3704_v50 = vsub.f32 %v638_v31, %v660_v39  ;;  %v3706_v52 = vpack.c.bf16 %v660_v39, %v656_v22  ;;  %v3733_v27 = vand.u32 4294901760, %v651_v14  ;;  %v773_v22 = vand.u32 4294901760, %v772_v11 }
 0x1a5   : > { %2373 = vmatmul.mubr.f32.gmra.mrb[2].mxu0 %v2043_v56 }
 0x1a6   : > { %v783_v41 = vand.u32 4294901760, %v3704_v50  ;;  %2792 = vmatprep.subr.bf16.mxu1 %v3706_v52  ;;  %2378 = vmatprep.mubr.f32.mxu0 %v3157_v28  ;;  %v3750_v13 = vsub.f32 %v651_v14, %v3733_v27  ;;  %v2799_v11 = vpack.c.bf16 %v3704_v50, %v3698_v42  ;;  %v1411_v42 = vsub.f32 %v3545_v9, %v1410_v10 }
 0x1a8   : > { %v629_v34 = vpop.permute.xlu1 %628  ;;  %v784_v0 = vsub.f32 %v3704_v50, %v783_v41  ;;  %v749_v31 = vand.u32 4294901760, %v3750_v13 }
 0x1a9   : > { %v637_v56 = vsel %vm634_vm3, %v629_v34, %v631_v23  ;;  %2382 = vmatmul.mubr.f32.gmra.mrb[4].mxu0 %v2054_v48  ;;  %v738_v48 = vand.u32 4294901760, %v3725_v45 }
 0x1aa   : > { %v662_v35 = vand.u32 4294901760, %v637_v56  ;;  %2387 = vmatprep.mubr.f32.mxu0 %v3157_v28  ;;  %v785_v21 = vand.u32 4294901760, %v784_v0  ;;  %v750_v34 = vsub.f32 %v3750_v13, %v749_v31 }
 0x1ac   : > { %v3740_v12 = vsub.f32 %v637_v56, %v662_v35  ;;  %v623_v18 = vpop.permute.xlu0 %622  ;;  %v2795_v40 = vpack.c.bf16 %v785_v21, %v773_v22  ;;  %v760_v56 = vand.u32 4294901760, %v3766_v32  ;;  %v2607_v21 = vld [vmem:[%s3962_s2] sm:$0xff]  ;;  %v3160_v22 = vmov 0  }
 0x1ad   : > { %v635_v19 = vsel %vm634_vm3, %v623_v18, %v625_v20  ;;  %2391 = vmatmul.mubr.f32.gmra.mrb[6].mxu0 %v2065_v6  ;;  %v729_v20 = vand.u32 4294901760, %v728_v57  ;;  %v739_v6 = vsub.f32 %v3725_v45, %v738_v48  ;;  %v751_v18 = vand.u32 4294901760, %v750_v34  ;;  %3079 = vset.pattern.permute.xlu0 %v3160_v22 }
 0x1ae   : > { %v789_v16 = vand.u32 4294901760, %v3740_v12  ;;  %v658_v17 = vand.u32 4294901760, %v635_v19  ;;  %2473 = vmatprep.mubr.f32.mxu0 %v3157_v28  ;;  %v761_v57 = vsub.f32 %v3766_v32, %v760_v56  ;;  %3080 = vset.pattern.permute.xlu1 %v3160_v22 }
 0x1af   : > { %v740_v30 = vand.u32 4294901760, %v739_v6  ;;  %2613 = vperm.xlu0 %3079, %v2607_v21  }
 0x1b0   : > { %v3756_v23 = vsub.f32 %v635_v19, %v658_v17  ;;  %v3758_v25 = vpack.c.bf16 %v662_v35, %v658_v17  ;;  %v790_v39 = vsub.f32 %v3740_v12, %v789_v16  ;;  %v762_v19 = vand.u32 4294901760, %v761_v57  ;;  %v2608_v17 = vld [vmem:[%s3962_s2 + $0x8] sm:$0xff] }
 0x1b1   : > { %2475 = vmatmul.mubr.f32.vlgmr.msra.gmra.mrb[0].mxu0 %v3589_v24  ;;  %2618 = vperm.xlu1 %3080, %v2608_v17  }
 0x1b2   : > { %v777_v49 = vand.u32 4294901760, %v3756_v23  ;;  %2862 = vmatpush1.bf16.msra.mxu0 %v3460_v29  ;;  %2794 = vmatpush1.bf16.msra.mxu1 %v3758_v25  ;;  %v791_v0 = vand.u32 4294901760, %v790_v39 }
 0x1b3   : > { %2796 = vmatprep.subr.bf16.mxu1 %v2795_v40  ;;  %2480 = vmatprep.mubr.f32.mxu0 %v3157_v28 }
 0x1b4   : > { %v778_v14 = vsub.f32 %v3756_v23, %v777_v49 }
 0x1b5   : > { %730 = vmatmul.mubr.f32.vlgmr.msra.gmra.mrb[0].mxu1 %v729_v20  ;;  %2482 = vmatmul.mubr.f32.gmra.mrb[2].mxu0 %v3600_v36  ;;  %v2801_v20 = vpack.c.bf16 %v3740_v12, %v3756_v23 }
 0x1b6   : > { %v779_v35 = vand.u32 4294901760, %v778_v14  ;;  %735 = vmatprep.mubr.f32.mxu1 %v3157_v28  ;;  %2487 = vmatprep.mubr.f32.mxu0 %v3157_v28 }
 0x1b8   : > { %v2797_v5 = vpack.c.bf16 %v791_v0, %v779_v35 }
 0x1b9   : > { %741 = vmatmul.mubr.f32.gmra.mrb[2].mxu1 %v740_v30  ;;  %2489 = vmatmul.mubr.f32.gmra.mrb[4].mxu0 %v3613_v47 }
 0x1ba   : > { %2798 = vmatpush1.bf16.msra.mxu1 %v2797_v5  ;;  %746 = vmatprep.mubr.f32.mxu1 %v3157_v28 }
 0x1bb   : > { %2800 = vmatprep.subr.bf16.mxu1 %v2799_v11  ;;  %2494 = vmatprep.mubr.f32.mxu0 %v3157_v28 }
 0x1bd   : > { %752 = vmatmul.mubr.f32.gmra.mrb[4].mxu1 %v751_v18  ;;  %2496 = vmatmul.mubr.f32.gmra.mrb[6].mxu0 %v3628_v58 }
 0x1be   : > { %757 = vmatprep.mubr.f32.mxu1 %v3157_v28  ;;  %2570 = vmatprep.mubr.f32.mxu0 %v3157_v28 }
 0x1c1   : > { %763 = vmatmul.mubr.f32.gmra.mrb[6].mxu1 %v762_v19  ;;  %2572 = vmatmul.mubr.f32.vlgmr.msra.gmra.mrb[0].mxu0 %v3589_v24  ;;  %v2609_v24 = vld [vmem:[%s3962_s2 + $0x10] sm:$0xff] }
 0x1c2   : > { %853 = vmatprep.mubr.f32.mxu1 %v3157_v28  ;;  %2577 = vmatprep.mubr.f32.mxu0 %v3157_v28 }
 0x1c3   : > { %2623 = vperm.xlu1 %3080, %v2609_v24  }
 0x1c5   : > { %855 = vmatmul.mubr.f32.vlgmr.msra.gmra.mrb[0].mxu1 %v3690_v26  ;;  %2579 = vmatmul.mubr.f32.gmra.mrb[2].mxu0 %v3600_v36  ;;  %v2807_v36 = vpack.c.bf16 %v783_v41, %v771_v59 }
 0x1c6   : > { %2802 = vmatpush1.bf16.msra.mxu1 %v2801_v20  ;;  %860 = vmatprep.mubr.f32.mxu1 %v3157_v28 }
 0x1c7   : > { %2804 = vmatprep.subr.bf16.mxu1 %v3706_v52  ;;  %2584 = vmatprep.mubr.f32.mxu0 %v3157_v28 }
 0x1c9   : > { %862 = vmatmul.mubr.f32.gmra.mrb[2].mxu1 %v3711_v44  ;;  %2586 = vmatmul.mubr.f32.gmra.mrb[4].mxu0 %v3613_v47  ;;  %v2809_v47 = vpack.c.bf16 %v789_v16, %v777_v49 }
 0x1ca   : > { %867 = vmatprep.mubr.f32.mxu1 %v3157_v28  ;;  %2591 = vmatprep.mubr.f32.mxu0 %v3157_v28 }
 0x1cd   : > { %869 = vmatmul.mubr.f32.gmra.mrb[4].mxu1 %v3733_v27  ;;  %2593 = vmatmul.mubr.f32.gmra.mrb[6].mxu0 %v3628_v58 }
 0x1ce   : > { %874 = vmatprep.mubr.f32.mxu1 %v3157_v28 }
 0x1d1   : > { %876 = vmatmul.mubr.f32.gmra.mrb[6].mxu1 %v3752_v15 }
 0x1d2   : > { %954 = vmatprep.mubr.f32.mxu1 %v3157_v28 }
 0x1d5   : > { %957 = vmatmul.mubr.f32.vlgmr.msra.gmra.mrb[0].mxu1 %v3709_v33 }
 0x1d6   : > { %2806 = vmatpush1.bf16.msra.mxu1 %v3758_v25  ;;  %962 = vmatprep.mubr.f32.mxu1 %v3157_v28 }
 0x1d7   : > { %2808 = vmatprep.subr.bf16.mxu1 %v2807_v36 }
 0x1d9   : > { %965 = vmatmul.mubr.f32.gmra.mrb[2].mxu1 %v3725_v45 }
 0x1da   : > { %970 = vmatprep.mubr.f32.mxu1 %v3157_v28 }
 0x1dd   : > { %973 = vmatmul.mubr.f32.gmra.mrb[4].mxu1 %v3750_v13 }
 0x1de   : > { %978 = vmatprep.mubr.f32.mxu1 %v3157_v28 }
 0x1e1   : > { %981 = vmatmul.mubr.f32.gmra.mrb[6].mxu1 %v3766_v32 }
 0x1e2   : > { %1055 = vmatprep.mubr.f32.mxu1 %v3157_v28 }
 0x1e5   : > { %1059 = vmatmul.mubr.f32.vlgmr.msra.gmra.mrb[0].mxu1 %v727_v61 }
 0x1e6   : > { %2810 = vmatpush1.bf16.msra.mxu1 %v2809_v47  ;;  %1064 = vmatprep.mubr.f32.mxu1 %v3157_v28 }
 0x1e7   : > { %2812 = vmatprep.subr.bf16.mxu1 %v3706_v52 }
 0x1e9   : > { %1068 = vmatmul.mubr.f32.gmra.mrb[2].mxu1 %v738_v48 }
 0x1ea   : > { %1073 = vmatprep.mubr.f32.mxu1 %v3157_v28 }
 0x1ed   : > { %1077 = vmatmul.mubr.f32.gmra.mrb[4].mxu1 %v749_v31 }
 0x1ee   : > { %1082 = vmatprep.mubr.f32.mxu1 %v3157_v28 }
 0x1f1   : > { %1086 = vmatmul.mubr.f32.gmra.mrb[6].mxu1 %v760_v56 }
 0x1f2   : > { %1168 = vmatprep.mubr.f32.mxu1 %v3157_v28 }
 0x1f5   : > { %1170 = vmatmul.mubr.f32.vlgmr.msra.gmra.mrb[0].mxu1 %v3690_v26 }
 0x1f6   : > { %2814 = vmatpush1.bf16.msra.mxu1 %v3758_v25  ;;  %1175 = vmatprep.mubr.f32.mxu1 %v3157_v28 }
 0x1f7   : > { %2816 = vmatprep.subr.bf16.mxu1 %v3460_v29  ;;  %v1378_v29 = vsub.f32 %v3501_v54, %v1377_v62  ;;  %v2610_v62 = vld [vmem:[%s3962_s2 + $0x18] sm:$0xff] }
 0x1f8   : > { %2628 = vperm.xlu0 %3079, %v2610_v62  }
 0x1f9   : > { %1177 = vmatmul.mubr.f32.gmra.mrb[2].mxu1 %v3711_v44  ;;  %v1379_v58 = vand.u32 4294901760, %v1378_v29 }
 0x1fa   : > { %1182 = vmatprep.mubr.f32.mxu1 %v3157_v28 }
 0x1fd   : > { %1184 = vmatmul.mubr.f32.gmra.mrb[4].mxu1 %v3733_v27 }
 0x1fe   : > { %1189 = vmatprep.mubr.f32.mxu1 %v3157_v28 }
 0x201   : > { %1191 = vmatmul.mubr.f32.gmra.mrb[6].mxu1 %v3752_v15 }
 0x202   : > { %1265 = vmatprep.mubr.f32.mxu1 %v3157_v28 }
 0x205   : > { %1267 = vmatmul.mubr.f32.vlgmr.msra.gmra.mrb[0].mxu1 %v3690_v26  ;;  %v1400_v26 = vsub.f32 %v3533_v3, %v1399_v8  ;;  %v1412_v8 = vand.u32 4294901760, %v1411_v42 }
 0x206   : > { %2818 = vmatpush1.bf16.msra.mxu1 %v3511_v37  ;;  %1272 = vmatprep.mubr.f32.mxu1 %v3157_v28  ;;  %v1389_v37 = vsub.f32 %v3518_v63, %v1388_v2 }
 0x207   : > { %2820 = vmatprep.subr.bf16.mxu1 %v3643_v1  ;;  %v1401_v2 = vand.u32 4294901760, %v1400_v26 }
 0x208   : > { %v1390_v1 = vand.u32 4294901760, %v1389_v37 }
 0x209   : > { %1274 = vmatmul.mubr.f32.gmra.mrb[2].mxu1 %v3711_v44 }
 0x20a   : > { %1279 = vmatprep.mubr.f32.mxu1 %v3157_v28 }
 0x20d   : > { %1281 = vmatmul.mubr.f32.gmra.mrb[4].mxu1 %v3733_v27 }
 0x20e   : > { %1286 = vmatprep.mubr.f32.mxu1 %v3157_v28 }
 0x211   : > { %1288 = vmatmul.mubr.f32.gmra.mrb[6].mxu1 %v3752_v15 }
 0x212   : > { %1374 = vmatprep.mubr.f32.mxu1 %v3157_v28 }
 0x215   : > { %1380 = vmatmul.mubr.f32.vlgmr.msra.gmra.mrb[0].mxu1 %v1379_v58 }
 0x216   : > { %2822 = vmatpush1.bf16.msra.mxu1 %v3539_v7  ;;  %1385 = vmatprep.mubr.f32.mxu1 %v3157_v28 }
 0x217   : > { %2824 = vmatprep.subr.bf16.mxu1 %v3478_v38 }
 0x219   : > { %1391 = vmatmul.mubr.f32.gmra.mrb[2].mxu1 %v1390_v1 }
 0x21a   : > { %1396 = vmatprep.mubr.f32.mxu1 %v3157_v28 }
 0x21d   : > { %1402 = vmatmul.mubr.f32.gmra.mrb[4].mxu1 %v1401_v2 }
 0x21e   : > { %1407 = vmatprep.mubr.f32.mxu1 %v3157_v28 }
 0x221   : > { %1413 = vmatmul.mubr.f32.gmra.mrb[6].mxu1 %v1412_v8 }
 0x222   : > { %1503 = vmatprep.mubr.f32.mxu1 %v3157_v28 }
 0x225   : > { %1505 = vmatmul.mubr.f32.vlgmr.msra.gmra.mrb[0].mxu1 %v3491_v46 }
 0x226   : > { %2826 = vmatpush1.bf16.msra.mxu1 %v2825_v53  ;;  %1510 = vmatprep.mubr.f32.mxu1 %v3157_v28 }
 0x229   : > { %1512 = vmatmul.mubr.f32.gmra.mrb[2].mxu1 %v3503_v55 }
 0x22a   : > { %1517 = vmatprep.mubr.f32.mxu1 %v3157_v28 }
 0x22d   : > { %1519 = vmatmul.mubr.f32.gmra.mrb[4].mxu1 %v3520_v43 }
 0x22e   : > { %1524 = vmatprep.mubr.f32.mxu1 %v3157_v28  ;;  %v2614_v7 = vpop.permute.xlu0 %2613 }
 0x231   : > { %1526 = vmatmul.mubr.f32.gmra.mrb[6].mxu1 %v3535_v4 }
 0x232   : > { %1604 = vmatprep.mubr.f32.mxu1 %v3157_v28 }
 0x235   : > { %1607 = vmatmul.mubr.f32.vlgmr.msra.gmra.mrb[0].mxu1 %v3501_v54 }
 0x236   : > { %1612 = vmatprep.mubr.f32.mxu1 %v3157_v28 }
 0x239   : > { %1615 = vmatmul.mubr.f32.gmra.mrb[2].mxu1 %v3518_v63 }
 0x23a   : > { %1620 = vmatprep.mubr.f32.mxu1 %v3157_v28 }
 0x23d   : > { %1623 = vmatmul.mubr.f32.gmra.mrb[4].mxu1 %v3533_v3  ;;  %v2619_v3 = vpop.permute.xlu1 %2618 }
 0x23e   : > { %1628 = vmatprep.mubr.f32.mxu1 %v3157_v28 }
 0x241   : > { %1631 = vmatmul.mubr.f32.gmra.mrb[6].mxu1 %v3545_v9 }
 0x242   : > { %v2624_v48 = vpop.permute.xlu1 %2623 }
 0x277   : > { %v2629_v34 = vpop.permute.xlu0 %2628 }
 0x294   : > { %v2573_v38 = vpop.f32.mrb[0].mxu0 }
 0x295   : > { %v2575_v46 = vpop.f32.mrb[1].mxu0 }
 0x298   : > { %v2580_v51 = vpop.f32.mrb[2].mxu0 }
 0x299   : > { %v2582_v55 = vpop.f32.mrb[3].mxu0 }
 0x29c   : > { %v2587_v60 = vpop.f32.mrb[4].mxu0 }
 0x29d   : > { %v2589_v43 = vpop.f32.mrb[5].mxu0 }
 0x2a0   : > { %v2594_v53 = vpop.f32.mrb[6].mxu0 }
 0x2a1   : > { %v2596_v54 = vpop.f32.mrb[7].mxu0 }
 0x308   : > { %v1608_v4 = vpop.f32.mrb[0].mxu1 }
 0x309   : > { %v2863_v63 = vadd.f32 %v2573_v38, %v1608_v4  ;;  %v1610_v10 = vpop.f32.mrb[1].mxu1 }
 0x30a   : > { %v2864_v50 = vadd.f32 %v2575_v46, %v1610_v10 }
 0x30b   : > { %v2631_v52 = vadd.f32 %v2863_v63, %v2614_v7 }
 0x30c   : > { %v2632_v28 = vadd.f32 %v2864_v50, %v2614_v7  ;;  %v1616_v33 = vpop.f32.mrb[2].mxu1 }
 0x30d   : > { %v2639_v9 = vmax.f32 %v2631_v52, 0.0  ;;  %v2865_v44 = vadd.f32 %v2580_v51, %v1616_v33  ;;  %v1618_v41 = vpop.f32.mrb[3].mxu1 }
 0x30e   : > { %v2640_v59 = vmax.f32 %v2632_v28, 0.0  ;;  %v2866_v61 = vadd.f32 %v2582_v55, %v1618_v41 }
 0x30f   : > { %2647 = vst [vmem:[%s3914_s7] sm:$0xff] %v2639_v9  ;;  %v2633_v45 = vadd.f32 %v2865_v44, %v2619_v3 }
 0x310   : > { %2648 = vst [vmem:[%s3914_s7 + $0x8] sm:$0xff] %v2640_v59  ;;  %v2634_v27 = vadd.f32 %v2866_v61, %v2619_v3  ;;  %v1624_v12 = vpop.f32.mrb[4].mxu1 }
 0x311   : > { %v2641_v13 = vmax.f32 %v2633_v45, 0.0  ;;  %v2867_v15 = vadd.f32 %v2587_v60, %v1624_v12  ;;  %v1626_v16 = vpop.f32.mrb[5].mxu1 }
 0x312   : > { %v2642_v23 = vmax.f32 %v2634_v27, 0.0  ;;  %v2868_v25 = vadd.f32 %v2589_v43, %v1626_v16 }
 0x313   : > { %2649 = vst [vmem:[%s3914_s7 + $0x10] sm:$0xff] %v2641_v13  ;;  %v2635_v40 = vadd.f32 %v2867_v15, %v2624_v48 }
 0x314   : > { %2650 = vst [vmem:[%s3914_s7 + $0x18] sm:$0xff] %v2642_v23  ;;  %v2636_v6 = vadd.f32 %v2868_v25, %v2624_v48  ;;  %v1632_v31 = vpop.f32.mrb[6].mxu1 }
 0x315   : > { %v2643_v32 = vmax.f32 %v2635_v40, 0.0  ;;  %v2869_v39 = vadd.f32 %v2594_v53, %v1632_v31  ;;  %v1634_v49 = vpop.f32.mrb[7].mxu1 }
 0x316   : > { %v2644_v14 = vmax.f32 %v2636_v6, 0.0  ;;  %v2870_v30 = vadd.f32 %v2596_v54, %v1634_v49  ;;  %2661 = sbr.rel (!%p3232_p5) target bundleno = 805 (0x325), region = 40  ;;  %v2679_v11 = vld [vmem:[%s3914_s7] sm:$0xff] (%p3232_p5) }
 0x317   : > { %2651 = vst [vmem:[%s3914_s7 + $0x20] sm:$0xff] %v2643_v32  ;;  %v2637_v56 = vadd.f32 %v2869_v39, %v2629_v34  ;;  %v2681_v18 = vld [vmem:[%s3914_s7 + $0x8] sm:$0xff] (%p3232_p5)  ;;  %2680 = vst [vmem:[%s2666_s11] sm:$0xff] (%p3232_p5), %v2679_v11 }
 0x318   : > { %2652 = vst [vmem:[%s3914_s7 + $0x28] sm:$0xff] %v2644_v14  ;;  %v2638_v0 = vadd.f32 %v2870_v30, %v2629_v34  ;;  %2682 = vst [vmem:[%s2666_s11 + $0x8] sm:$0xff] (%p3232_p5), %v2681_v18 }
 0x319   : > { %v2645_v35 = vmax.f32 %v2637_v56, 0.0 }
 0x31a   : > { %v2646_v5 = vmax.f32 %v2638_v0, 0.0  ;;  %v2683_v57 = vld [vmem:[%s3914_s7 + $0x10] sm:$0xff] (%p3232_p5) }
 0x31b   : > { %2653 = vst [vmem:[%s3914_s7 + $0x30] sm:$0xff] %v2645_v35  ;;  %v2685_v19 = vld [vmem:[%s3914_s7 + $0x18] sm:$0xff] (%p3232_p5)  ;;  %2684 = vst [vmem:[%s2666_s11 + $0x20] sm:$0xff] (%p3232_p5), %v2683_v57 }
 0x31c   : > { %2654 = vst [vmem:[%s3914_s7 + $0x38] sm:$0xff] %v2646_v5  ;;  %2686 = vst [vmem:[%s2666_s11 + $0x28] sm:$0xff] (%p3232_p5), %v2685_v19 }
 0x31e   : > { %v2687_v21 = vld [vmem:[%s3914_s7 + $0x20] sm:$0xff] }
 0x31f   : > { %v2689_v17 = vld [vmem:[%s3914_s7 + $0x28] sm:$0xff]  ;;  %2688 = vst [vmem:[%s2666_s11 + $0x40] sm:$0xff] %v2687_v21 }
 0x320   : > { %2690 = vst [vmem:[%s2666_s11 + $0x48] sm:$0xff] %v2689_v17 }
 0x322   : > { %v2691_v22 = vld [vmem:[%s3914_s7 + $0x30] sm:$0xff] }
 0x323   : > { %v2693_v20 = vld [vmem:[%s3914_s7 + $0x38] sm:$0xff]  ;;  %2692 = vst [vmem:[%s2666_s11 + $0x60] sm:$0xff] %v2691_v22 }
 0x324   : > { %2694 = vst [vmem:[%s2666_s11 + $0x68] sm:$0xff] %v2693_v20 }
 0x325 PF: > { %s14_s21 = sadd.s32 1, %s3135_s21   ;;  %s3966_s15 = smov %s3115_s16 }
 0x326   : > { %p11_p11 = scmp.ge.s32.totalorder %s14_s21, 6   ;;  %s3967_s16 = smov %s3243_s30 }
 0x327   : > { %s3968_s17 = smov %s3127_s19  ;;  %s3969_s18 = smov %s3131_s20 }
 0x328   : > { %s3970_s19 = smov %s3973_s22  ;;  %s3971_s20 = smov %s3977_s23 }
 0x329   :  { %13 = sbr.rel (!%p11_p11) target bundleno = 4 (0x4), region = 91 }

</bundles_post_ra>
